<compile_context>
chip_gen: v5e
topology: v5e:2x2
jax: 0.10.0
libtpu: 0.0.40
codegen_flags: <defaults>
</compile_context>

<pallas_src>
import functools
import math

import jax
import jax.numpy as jnp
from jax.experimental import pallas as pl
from jax.experimental.pallas import tpu as pltpu


def _round_up(x, m):
    return ((x + m - 1) // m) * m


def _chip_info():
    """Heuristic (vmem_limit_bytes, tensorcores_per_chip) from the device kind."""
    try:
        kind = jax.devices()[0].device_kind.lower()
    except Exception:
        kind = ""
    if "v7" in kind:                     # v7x: 64 MiB VMEM per TC, 2 TCs per chip
        return 48 * 1024 * 1024, 2
    if "v6" in kind or "v5" in kind:     # v5e/v6e: 128 MiB VMEM, 1 TC per chip
        return 96 * 1024 * 1024, 1
    return 32 * 1024 * 1024, 1           # unknown chip: conservative default


def _supports_bf16_eup():
    """bf16 exp on the EUP is only profitable/available on v6e/v7x (not v5e)."""
    try:
        kind = jax.devices()[0].device_kind.lower()
    except Exception:
        return False
    return ("v6" in kind) or ("v7" in kind)


def _choose_kv_tile(seq_pad, target=512):
    """KV tile: multiple of 8 (sublane), divides seq_pad, <= target (MXU-friendly)."""
    if seq_pad <= target:
        return seq_pad
    t = target - (target % 8)
    while t >= 8:
        if seq_pad % t == 0:
            return t
        t -= 8
    return seq_pad


def _vmem_working_set(bb, seq, e_pad, kv_tile):
    """Rough per-grid-step VMEM footprint (bytes) used to size block_b."""
    act = bb * seq * e_pad
    total = 0
    total += 2 * 2 * act * 4                      # x in + out blocks, f32, double-buffered
    total += act * 3 * 4                          # fused QKV projection result (f32)
    total += act * 2                              # q (bf16)
    total += 2 * act * 2                          # K / V VMEM scratch (bf16)
    total += act * 4                              # online-softmax accumulator (f32)
    total += 2 * bb * seq * kv_tile * 4           # score tile + probabilities (f32)
    total += 2 * (e_pad * 3 * e_pad * 2 + 4 * e_pad * 4)   # weights / bias / gamma / beta
    return total


def _choose_block_b(batch, seq, e_pad, kv_tile, vmem_limit, n_cores):
    """Largest batch block that fits the VMEM budget; split only when >= 2 TCs exist."""
    budget = int(vmem_limit * 0.75)
    cands = [d for d in range(batch, 0, -1) if batch % d == 0]
    if n_cores >= 2 and batch >= 2:
        split = [d for d in cands if d <= batch // 2]   # keep both v7x TCs busy
        if split:
            cands = split
    for d in cands:
        if _vmem_working_set(d, seq, e_pad, kv_tile) <= budget:
            return d
    return 1


def _attention_kernel(x_ref, wqkv_ref, bqkv_ref, gamma_ref, beta_ref, o_ref,
                      k_scr, v_scr, *,
                      embed_dim, embed_pad, seq_pad, kv_tile, eps, exp_bf16):
    blk_b = x_ref.shape[0]
    n_kv = seq_pad // kv_tile

    x = x_ref[...]                                    # (Bb, Sp, Ep) f32, pad lanes == 0

    # ---- fused Q/K/V projection: one (Bb*Sp, Ep) x (Ep, 3Ep) MXU matmul ----
    # Sp % 8 == 0 and Ep % 128 == 0 -> the reshape is a pure view (no VMEM copy).
    x2d = x.reshape(blk_b * seq_pad, embed_pad)
    qkv = jnp.dot(x2d.astype(jnp.bfloat16), wqkv_ref[...],
                  preferred_element_type=jnp.float32) + bqkv_ref[...]

    # Lane-aligned static slices; split the leading dim back out (still a view).
    q = qkv[:, 0:embed_pad].reshape(blk_b, seq_pad, embed_pad).astype(jnp.bfloat16)
    k_scr[...] = qkv[:, embed_pad:2 * embed_pad].reshape(
        blk_b, seq_pad, embed_pad).astype(jnp.bfloat16)
    v_scr[...] = qkv[:, 2 * embed_pad:3 * embed_pad].reshape(
        blk_b, seq_pad, embed_pad).astype(jnp.bfloat16)

    row = jax.lax.broadcasted_iota(jnp.int32, (1, seq_pad, kv_tile), 1)
    col0 = jax.lax.broadcasted_iota(jnp.int32, (1, seq_pad, kv_tile), 2)

    def kv_step(j, carry):
        m_prev, l_prev, acc_prev = carry
        start = j * kv_tile
        if not isinstance(start, int):
            start = pl.multiple_of(start, kv_tile)
        k_t = k_scr[:, pl.ds(start, kv_tile), :]
        v_t = v_scr[:, pl.ds(start, kv_tile), :]

        # (Bb, Sp, kv_tile) f32; contract last axes -> no materialized k.T (no XLU).
        s = jax.lax.dot_general(
            q, k_t, dimension_numbers=(((2,), (2,)), ((0,), (0,))),
            preferred_element_type=jnp.float32)
        # Finite causal mask; the diagonal of every row is always unmasked so the
        # running max stays finite (no NaN risk).
        s = jnp.where(j * kv_tile + col0 <= row, s, -1e30)

        m_cur = jnp.max(s, axis=-1, keepdims=True)
        m_new = jnp.maximum(m_prev, m_cur)
        alpha = jnp.exp(m_prev - m_new)                 # f32 rescale of old state

        if exp_bf16:
            # v6e/v7x: exp over the O(S*kv) interior in bf16 (bf16 EUP), sum in f32.
            p = jnp.exp((s - m_new).astype(jnp.bfloat16))
            p_sum = jnp.sum(p.astype(jnp.float32), axis=-1, keepdims=True)
        else:
            p_f32 = jnp.exp(s - m_new)
            p_sum = jnp.sum(p_f32, axis=-1, keepdims=True)
            p = p_f32.astype(jnp.bfloat16)

        # Deferred normalization: un-normalized probabilities straight into the MXU.
        pv = jax.lax.dot_general(
            p, v_t, dimension_numbers=(((2,), (1,)), ((0,), (0,))),
            preferred_element_type=jnp.float32)         # (Bb, Sp, Ep) f32

        l_new = alpha * l_prev + p_sum
        acc_new = alpha * acc_prev + pv
        return m_new, l_new, acc_new

    m0 = jnp.full((blk_b, seq_pad, 1), -1e30, jnp.float32)
    l0 = jnp.zeros((blk_b, seq_pad, 1), jnp.float32)
    acc0 = jnp.zeros((blk_b, seq_pad, embed_pad), jnp.float32)
    if n_kv == 1:
        _, l_f, acc_f = kv_step(0, (m0, l0, acc0))       # single tile: no loop at all
    else:
        _, l_f, acc_f = jax.lax.fori_loop(0, n_kv, kv_step, (m0, l0, acc0))

    # ---- deferred softmax normalization + residual ----
    r = pl.reciprocal(l_f, approx=True)                  # EUP
    r = r * (2.0 - l_f * r)                              # one Newton refinement step
    y = acc_f * r + x                                    # pad lanes remain exactly 0

    # ---- LayerNorm over the real (unpadded) feature width ----
    inv_n = 1.0 / embed_dim
    mean = jnp.sum(y, axis=-1, keepdims=True) * inv_n
    feat = jax.lax.broadcasted_iota(jnp.int32, (1, 1, embed_pad), 2)
    c = jnp.where(feat < embed_dim, y - mean, 0.0)       # zero the pad lanes
    var = jnp.sum(c * c, axis=-1, keepdims=True) * inv_n
    out = (c * jax.lax.rsqrt(var + eps)
           * gamma_ref[...].reshape(1, 1, embed_pad)
           + beta_ref[...].reshape(1, 1, embed_pad))
    o_ref[...] = out.astype(o_ref.dtype)


def prepare_params(wq, bq, wk, bk, wv, bv, gamma, beta):
    """Fuse/pad/cast the parameters ONCE (hoisted out of the per-call path).

    Weights are (E, E) in (in, out) layout (W_kernel = W_torch.T); biases / gamma /
    beta are (1, E). The 1/sqrt(E) attention scale is folded into the Q columns.
    NOTE: the kernel relies on the padded columns/rows being exactly zero (they are,
    because jnp.pad zero-fills) — do not hand this non-zero-padded tensors.
    """
    E = wq.shape[0]
    E_pad = _round_up(E, 128)
    inv_sqrt_e = 1.0 / math.sqrt(E)

    def pad_mat(w):
        return jnp.pad(w, ((0, E_pad - E), (0, E_pad - E)))

    def pad_row(r):
        return jnp.pad(jnp.asarray(r).reshape(1, E), ((0, 0), (0, E_pad - E)))

    wqkv = jnp.concatenate(
        [pad_mat(wq) * inv_sqrt_e, pad_mat(wk), pad_mat(wv)], axis=1
    ).astype(jnp.bfloat16)                                            # (E_pad, 3*E_pad)
    bqkv = jnp.concatenate(
        [pad_row(bq) * inv_sqrt_e, pad_row(bk), pad_row(bv)], axis=1)  # (1, 3*E_pad) f32
    return dict(embed_dim=E, embed_pad=E_pad, wqkv=wqkv, bqkv=bqkv,
                gamma=pad_row(gamma), beta=pad_row(beta))


_BUFFERED_WEIGHTS_OK = None   # cached capability check for pl.Buffered(1) weight specs


def single_head_self_attention(x, params, *, eps=1e-5, block_b=None,
                               kv_tile=None, exp_bf16=None):
    """x: (B, S, E) f32; params: output of prepare_params()."""
    global _BUFFERED_WEIGHTS_OK
    B, S, E = x.shape
    assert E == params["embed_dim"]
    E_pad = params["embed_pad"]

    # Pad S to a sublane multiple (reshape stays a view) and E to a lane multiple
    # (lane-dense IO). Skip the extra HBM pad/slice passes when already aligned.
    S_pad = _round_up(S, 8)
    pad_s, pad_e = S_pad - S, E_pad - E
    x_p = x if (pad_s == 0 and pad_e == 0) else jnp.pad(
        x, ((0, 0), (0, pad_s), (0, pad_e)))

    vmem_limit, n_cores = _chip_info()
    if kv_tile is None:
        kv_tile = _choose_kv_tile(S_pad)
    assert S_pad % kv_tile == 0
    if exp_bf16 is None:
        exp_bf16 = _supports_bf16_eup()
    if block_b is None:
        block_b = _choose_block_b(B, S_pad, E_pad, kv_tile, vmem_limit, n_cores)
    assert B % block_b == 0
    grid_b = B // block_b

    kernel = functools.partial(
        _attention_kernel, embed_dim=E, embed_pad=E_pad, seq_pad=S_pad,
        kv_tile=kv_tile, eps=eps, exp_bf16=exp_bf16)

    def build(single_buffer_weights):
        def const_spec(shape):
            if single_buffer_weights:
                # grid-invariant block: one buffer is enough (saves VMEM, esp. v7x)
                return pl.BlockSpec(shape, lambda b: (0, 0),
                                    pipeline_mode=pl.Buffered(1))
            return pl.BlockSpec(shape, lambda b: (0, 0))

        return pl.pallas_call(
            kernel,
            out_shape=jax.ShapeDtypeStruct((B, S_pad, E_pad), x.dtype),
            grid_spec=pltpu.PrefetchScalarGridSpec(
                num_scalar_prefetch=0,
                grid=(grid_b,),
                in_specs=[
                    pl.BlockSpec((block_b, S_pad, E_pad), lambda b: (b, 0, 0)),  # x
                    const_spec((E_pad, 3 * E_pad)),                              # W_qkv
                    const_spec((1, 3 * E_pad)),                                  # b_qkv
                    const_spec((1, E_pad)),                                      # gamma
                    const_spec((1, E_pad)),                                      # beta
                ],
                out_specs=pl.BlockSpec((block_b, S_pad, E_pad), lambda b: (b, 0, 0)),
                scratch_shapes=[
                    pltpu.VMEM((block_b, S_pad, E_pad), jnp.bfloat16),   # K
                    pltpu.VMEM((block_b, S_pad, E_pad), jnp.bfloat16),   # V
                ],
            ),
            compiler_params=pltpu.CompilerParams(
                dimension_semantics=("parallel",),
                vmem_limit_bytes=vmem_limit,
            ),
        )

    args = (x_p, params["wqkv"], params["bqkv"], params["gamma"], params["beta"])
    if _BUFFERED_WEIGHTS_OK is None:
        try:
            out = jax.block_until_ready(build(True)(*args))
            _BUFFERED_WEIGHTS_OK = True
        except Exception:
            _BUFFERED_WEIGHTS_OK = False
            out = build(False)(*args)
    else:
        out = build(_BUFFERED_WEIGHTS_OK)(*args)

    if pad_s or pad_e:
        out = out[:, :S, :E]
    return out


def _reference(x, wq, bq, wk, bk, wv, bv, gamma, beta, eps=1e-5):
    """Pure-JAX reference matching the PyTorch forward pass (f32 everywhere)."""
    q = x @ wq + bq
    k = x @ wk + bk
    v = x @ wv + bv
    scores = jnp.einsum("bse,bte->bst", q, k) / math.sqrt(x.shape[-1])
    s = x.shape[1]
    mask = jnp.tril(jnp.ones((s, s), dtype=bool))
    scores = jnp.where(mask[None], scores, -jnp.inf)
    w = jax.nn.softmax(scores, axis=-1)
    attn = jnp.einsum("bst,bte->bse", w, v)
    y = attn + x
    mean = jnp.mean(y, axis=-1, keepdims=True)
    var = jnp.mean((y - mean) ** 2, axis=-1, keepdims=True)
    return (y - mean) * jax.lax.rsqrt(var + eps) * gamma + beta


if __name__ == "__main__":
    B, S, E = 2, 8, 32
    key = jax.random.PRNGKey(0)
    kx, kq, kk, kv, kbq, kbk, kbv = jax.random.split(key, 7)

    x = jax.random.normal(kx, (B, S, E), dtype=jnp.float32)

    # Deterministic synthetic parameters (nn.Linear-like scale), (in, out) layout.
    scale = 1.0 / math.sqrt(E)
    wq = jax.random.uniform(kq, (E, E), jnp.float32, -scale, scale)
    wk = jax.random.uniform(kk, (E, E), jnp.float32, -scale, scale)
    wv = jax.random.uniform(kv, (E, E), jnp.float32, -scale, scale)
    bq = jax.random.uniform(kbq, (1, E), jnp.float32, -scale, scale)
    bk = jax.random.uniform(kbk, (1, E), jnp.float32, -scale, scale)
    bv = jax.random.uniform(kbv, (1, E), jnp.float32, -scale, scale)
    gamma = jnp.ones((1, E), jnp.float32)   # LayerNorm weight
    beta = jnp.zeros((1, E), jnp.float32)   # LayerNorm bias

    params = prepare_params(wq, bq, wk, bk, wv, bv, gamma, beta)   # fused once
    out = single_head_self_attention(x, params)
    out = jax.block_until_ready(out)

    ref = _reference(x, wq, bq, wk, bk, wv, bv, gamma, beta)
    assert out.shape == x.shape
    # bf16 MXU inputs (and bf16 exp on v6e/v7x) with f32 accumulation -> loose tolerance.
    max_err = float(jnp.max(jnp.abs(out - ref)))
    assert jnp.allclose(out, ref, atol=3e-2, rtol=3e-2), \
        f"mismatch vs reference, max_err={max_err}"

    print("KERNEL_OK")
</pallas_src>

<mosaic_0001>
module attributes {stable_mosaic.version = 11 : i64} {
  func.func @_attention_kernel(%arg0: i32, %arg1: memref<2x8x128xf32, #tpu.memory_space<vmem>>, %arg2: memref<128x384xbf16, #tpu.memory_space<vmem>>, %arg3: memref<1x384xf32, #tpu.memory_space<vmem>>, %arg4: memref<1x128xf32, #tpu.memory_space<vmem>>, %arg5: memref<1x128xf32, #tpu.memory_space<vmem>>, %arg6: memref<2x8x128xf32, #tpu.memory_space<vmem>>, %arg7: memref<2x8x128xbf16, #tpu.memory_space<vmem>>, %arg8: memref<2x8x128xbf16, #tpu.memory_space<vmem>>) attributes {dimension_semantics = [#tpu.dimension_semantics<parallel>], iteration_bounds = array<i64: 1>, scalar_prefetch = 0 : i64, scratch_operands = 2 : i64, tpu.core_type = #tpu.core_type<tc>, window_params = [{transform_indices = @transform_0, window_bounds = array<i64: 2, 8, 128>}, {pipeline_mode = #tpu.pipeline_mode<synchronous>, transform_indices = @transform_1, window_bounds = array<i64: 128, 384>}, {pipeline_mode = #tpu.pipeline_mode<synchronous>, transform_indices = @transform_2, window_bounds = array<i64: 1, 384>}, {pipeline_mode = #tpu.pipeline_mode<synchronous>, transform_indices = @transform_3, window_bounds = array<i64: 1, 128>}, {pipeline_mode = #tpu.pipeline_mode<synchronous>, transform_indices = @transform_4, window_bounds = array<i64: 1, 128>}, {transform_indices = @transform_5, window_bounds = array<i64: 2, 8, 128>}]} {
    %c0 = arith.constant 0 : index
    %c0_0 = arith.constant 0 : index
    %c0_1 = arith.constant 0 : index
    %0 = vector.load %arg1[%c0, %c0_0, %c0_1] : memref<2x8x128xf32, #tpu.memory_space<vmem>>, vector<2x8x128xf32>
    %1 = vector.shape_cast %0 : vector<2x8x128xf32> to vector<16x128xf32>
    %2 = arith.truncf %1 : vector<16x128xf32> to vector<16x128xbf16>
    %c0_2 = arith.constant 0 : index
    %c0_3 = arith.constant 0 : index
    %3 = vector.load %arg2[%c0_2, %c0_3] : memref<128x384xbf16, #tpu.memory_space<vmem>>, vector<128x384xbf16>
    %cst = arith.constant dense<0.000000e+00> : vector<16x384xf32>
    %4 = tpu.matmul %2, %3, %cst {dimension_numbers = #tpu.dot_dimension_numbers<[1], [0], [0], [1], [0, 0, 1, 1], [], []>} : vector<16x128xbf16>, vector<128x384xbf16>, vector<16x384xf32> -> vector<16x384xf32>
    %c0_4 = arith.constant 0 : index
    %c0_5 = arith.constant 0 : index
    %5 = vector.load %arg3[%c0_4, %c0_5] : memref<1x384xf32, #tpu.memory_space<vmem>>, vector<1x384xf32>
    %6 = vector.broadcast %5 : vector<1x384xf32> to vector<16x384xf32>
    %7 = arith.addf %4, %6 : vector<16x384xf32>
    %8 = vector.extract_strided_slice %7 {offsets = [0, 0], sizes = [16, 128], strides = [1, 1]} : vector<16x384xf32> to vector<16x128xf32>
    %9 = vector.shape_cast %8 : vector<16x128xf32> to vector<2x8x128xf32>
    %10 = arith.truncf %9 : vector<2x8x128xf32> to vector<2x8x128xbf16>
    %11 = vector.extract_strided_slice %7 {offsets = [0, 128], sizes = [16, 128], strides = [1, 1]} : vector<16x384xf32> to vector<16x128xf32>
    %12 = vector.shape_cast %11 : vector<16x128xf32> to vector<2x8x128xf32>
    %13 = arith.truncf %12 : vector<2x8x128xf32> to vector<2x8x128xbf16>
    %c0_6 = arith.constant 0 : index
    %c0_7 = arith.constant 0 : index
    %c0_8 = arith.constant 0 : index
    %14 = vector.load %arg7[%c0_6, %c0_7, %c0_8] : memref<2x8x128xbf16, #tpu.memory_space<vmem>>, vector<2x8x128xbf16>
    tpu.vector_store %arg7[%c0_6, %c0_7, %c0_8], %13 {strides = array<i32>} : memref<2x8x128xbf16, #tpu.memory_space<vmem>>, vector<2x8x128xbf16>,
    %15 = vector.extract_strided_slice %7 {offsets = [0, 256], sizes = [16, 128], strides = [1, 1]} : vector<16x384xf32> to vector<16x128xf32>
    %16 = vector.shape_cast %15 : vector<16x128xf32> to vector<2x8x128xf32>
    %17 = arith.truncf %16 : vector<2x8x128xf32> to vector<2x8x128xbf16>
    %c0_9 = arith.constant 0 : index
    %c0_10 = arith.constant 0 : index
    %c0_11 = arith.constant 0 : index
    %18 = vector.load %arg8[%c0_9, %c0_10, %c0_11] : memref<2x8x128xbf16, #tpu.memory_space<vmem>>, vector<2x8x128xbf16>
    tpu.vector_store %arg8[%c0_9, %c0_10, %c0_11], %17 {strides = array<i32>} : memref<2x8x128xbf16, #tpu.memory_space<vmem>>, vector<2x8x128xbf16>,
    %19 = tpu.iota {dimensions = array<i32: 1>} : vector<1x8x8xi32>
    %20 = tpu.iota {dimensions = array<i32: 2>} : vector<1x8x8xi32>
    %cst_12 = arith.constant -1.000000e+30 : f32
    %21 = vector.broadcast %cst_12 : f32 to vector<2x8x1xf32>
    %cst_13 = arith.constant 0.000000e+00 : f32
    %22 = vector.broadcast %cst_13 : f32 to vector<2x8x1xf32>
    %cst_14 = arith.constant 0.000000e+00 : f32
    %23 = vector.broadcast %cst_14 : f32 to vector<2x8x128xf32>
    %c0_15 = arith.constant 0 : index
    %c0_16 = arith.constant 0 : index
    %c0_17 = arith.constant 0 : index
    %24 = vector.load %arg7[%c0_15, %c0_16, %c0_17] : memref<2x8x128xbf16, #tpu.memory_space<vmem>>, vector<2x8x128xbf16>
    %c0_18 = arith.constant 0 : index
    %c0_19 = arith.constant 0 : index
    %c0_20 = arith.constant 0 : index
    %25 = vector.load %arg8[%c0_18, %c0_19, %c0_20] : memref<2x8x128xbf16, #tpu.memory_space<vmem>>, vector<2x8x128xbf16>
    %cst_21 = arith.constant dense<0.000000e+00> : vector<2x8x8xf32>
    %26 = tpu.matmul %10, %24, %cst_21 {dimension_numbers = #tpu.dot_dimension_numbers<[2], [2], [1], [1], [0, 0, 0, 1, 1, 1], [0], [0]>} : vector<2x8x128xbf16>, vector<2x8x128xbf16>, vector<2x8x8xf32> -> vector<2x8x8xf32>
    %c0_i32 = arith.constant 0 : i32
    %27 = vector.broadcast %c0_i32 : i32 to vector<1x8x8xi32>
    %28 = arith.addi %27, %20 : vector<1x8x8xi32>
    %29 = arith.cmpi sle, %28, %19 : vector<1x8x8xi32>
    %cst_22 = arith.constant -1.000000e+30 : f32
    %30 = vector.shape_cast %29 : vector<1x8x8xi1> to vector<1x8x8xi1>
    %31 = vector.broadcast %30 : vector<1x8x8xi1> to vector<2x8x8xi1>
    %32 = vector.broadcast %cst_22 : f32 to vector<2x8x8xf32>
    %33 = arith.select %31, %26, %32 : vector<2x8x8xi1>, vector<2x8x8xf32>
    %cst_23 = arith.constant dense<0xFF800000> : vector<2x8xf32>
    %34 = vector.multi_reduction <maximumf>, %33, %cst_23 [2] : vector<2x8x8xf32> to vector<2x8xf32>
    %35 = vector.shape_cast %34 : vector<2x8xf32> to vector<2x8x1xf32>
    %36 = arith.maximumf %21, %35 : vector<2x8x1xf32>
    %37 = arith.subf %21, %36 : vector<2x8x1xf32>
    %38 = math.exp %37 : vector<2x8x1xf32>
    %39 = vector.broadcast %36 : vector<2x8x1xf32> to vector<2x8x8xf32>
    %40 = arith.subf %33, %39 : vector<2x8x8xf32>
    %41 = math.exp %40 : vector<2x8x8xf32>
    %cst_24 = arith.constant dense<0.000000e+00> : vector<2x8xf32>
    %42 = vector.multi_reduction <add>, %41, %cst_24 [2] : vector<2x8x8xf32> to vector<2x8xf32>
    %43 = vector.shape_cast %42 : vector<2x8xf32> to vector<2x8x1xf32>
    %44 = arith.truncf %41 : vector<2x8x8xf32> to vector<2x8x8xbf16>
    %cst_25 = arith.constant dense<0.000000e+00> : vector<2x8x128xf32>
    %45 = tpu.matmul %44, %25, %cst_25 {dimension_numbers = #tpu.dot_dimension_numbers<[2], [1], [1], [2], [0, 0, 0, 1, 1, 2], [0], [0]>} : vector<2x8x8xbf16>, vector<2x8x128xbf16>, vector<2x8x128xf32> -> vector<2x8x128xf32>
    %46 = arith.mulf %38, %22 : vector<2x8x1xf32>
    %47 = arith.addf %46, %43 : vector<2x8x1xf32>
    %48 = vector.broadcast %38 : vector<2x8x1xf32> to vector<2x8x128xf32>
    %49 = arith.mulf %48, %23 : vector<2x8x128xf32>
    %50 = arith.addf %49, %45 : vector<2x8x128xf32>
    %51 = tpu.reciprocal %47 {approx = true} : vector<2x8x1xf32> -> vector<2x8x1xf32>
    %52 = arith.mulf %47, %51 : vector<2x8x1xf32>
    %cst_26 = arith.constant 2.000000e+00 : f32
    %53 = vector.broadcast %cst_26 : f32 to vector<2x8x1xf32>
    %54 = arith.subf %53, %52 : vector<2x8x1xf32>
    %55 = arith.mulf %51, %54 : vector<2x8x1xf32>
    %56 = vector.broadcast %55 : vector<2x8x1xf32> to vector<2x8x128xf32>
    %57 = arith.mulf %50, %56 : vector<2x8x128xf32>
    %58 = arith.addf %57, %0 : vector<2x8x128xf32>
    %cst_27 = arith.constant dense<0.000000e+00> : vector<2x8xf32>
    %59 = vector.multi_reduction <add>, %58, %cst_27 [2] : vector<2x8x128xf32> to vector<2x8xf32>
    %60 = vector.shape_cast %59 : vector<2x8xf32> to vector<2x8x1xf32>
    %cst_28 = arith.constant 3.125000e-02 : f32
    %61 = vector.broadcast %cst_28 : f32 to vector<2x8x1xf32>
    %62 = arith.mulf %60, %61 : vector<2x8x1xf32>
    %63 = tpu.iota {dimensions = array<i32: 2>} : vector<1x1x128xi32>
    %c32_i32 = arith.constant 32 : i32
    %64 = vector.broadcast %c32_i32 : i32 to vector<1x1x128xi32>
    %65 = arith.cmpi slt, %63, %64 : vector<1x1x128xi32>
    %66 = vector.broadcast %62 : vector<2x8x1xf32> to vector<2x8x128xf32>
    %67 = arith.subf %58, %66 : vector<2x8x128xf32>
    %cst_29 = arith.constant 0.000000e+00 : f32
    %68 = vector.shape_cast %65 : vector<1x1x128xi1> to vector<1x1x128xi1>
    %69 = vector.broadcast %68 : vector<1x1x128xi1> to vector<2x8x128xi1>
    %70 = vector.broadcast %cst_29 : f32 to vector<2x8x128xf32>
    %71 = arith.select %69, %67, %70 : vector<2x8x128xi1>, vector<2x8x128xf32>
    %72 = arith.mulf %71, %71 : vector<2x8x128xf32>
    %cst_30 = arith.constant dense<0.000000e+00> : vector<2x8xf32>
    %73 = vector.multi_reduction <add>, %72, %cst_30 [2] : vector<2x8x128xf32> to vector<2x8xf32>
    %74 = vector.shape_cast %73 : vector<2x8xf32> to vector<2x8x1xf32>
    %cst_31 = arith.constant 3.125000e-02 : f32
    %75 = vector.broadcast %cst_31 : f32 to vector<2x8x1xf32>
    %76 = arith.mulf %74, %75 : vector<2x8x1xf32>
    %cst_32 = arith.constant 9.99999974E-6 : f32
    %77 = vector.broadcast %cst_32 : f32 to vector<2x8x1xf32>
    %78 = arith.addf %76, %77 : vector<2x8x1xf32>
    %79 = math.rsqrt %78 : vector<2x8x1xf32>
    %80 = vector.broadcast %79 : vector<2x8x1xf32> to vector<2x8x128xf32>
    %81 = arith.mulf %71, %80 : vector<2x8x128xf32>
    %c0_33 = arith.constant 0 : index
    %c0_34 = arith.constant 0 : index
    %82 = vector.load %arg4[%c0_33, %c0_34] : memref<1x128xf32, #tpu.memory_space<vmem>>, vector<1x128xf32>
    %83 = vector.shape_cast %82 : vector<1x128xf32> to vector<1x1x128xf32>
    %84 = vector.broadcast %83 : vector<1x1x128xf32> to vector<2x8x128xf32>
    %85 = arith.mulf %81, %84 : vector<2x8x128xf32>
    %c0_35 = arith.constant 0 : index
    %c0_36 = arith.constant 0 : index
    %86 = vector.load %arg5[%c0_35, %c0_36] : memref<1x128xf32, #tpu.memory_space<vmem>>, vector<1x128xf32>
    %87 = vector.shape_cast %86 : vector<1x128xf32> to vector<1x1x128xf32>
    %88 = vector.broadcast %87 : vector<1x1x128xf32> to vector<2x8x128xf32>
    %89 = arith.addf %85, %88 : vector<2x8x128xf32>
    %c0_37 = arith.constant 0 : index
    %c0_38 = arith.constant 0 : index
    %c0_39 = arith.constant 0 : index
    %90 = vector.load %arg6[%c0_37, %c0_38, %c0_39] : memref<2x8x128xf32, #tpu.memory_space<vmem>>, vector<2x8x128xf32>
    tpu.vector_store %arg6[%c0_37, %c0_38, %c0_39], %89 {strides = array<i32>} : memref<2x8x128xf32, #tpu.memory_space<vmem>>, vector<2x8x128xf32>,
    return
  }
  func.func @transform_0(%arg0: i32) -> (i32, i32, i32) {
    %c0_i32 = arith.constant 0 : i32
    %c0_i32_0 = arith.constant 0 : i32
    %c0_i32_1 = arith.constant 0 : i32
    return %arg0, %c0_i32, %c0_i32_0 : i32, i32, i32
  }
  func.func @transform_1(%arg0: i32) -> (i32, i32) {
    %c0_i32 = arith.constant 0 : i32
    %c0_i32_0 = arith.constant 0 : i32
    %c0_i32_1 = arith.constant 0 : i32
    return %c0_i32, %c0_i32_0 : i32, i32
  }
  func.func @transform_2(%arg0: i32) -> (i32, i32) {
    %c0_i32 = arith.constant 0 : i32
    %c0_i32_0 = arith.constant 0 : i32
    %c0_i32_1 = arith.constant 0 : i32
    return %c0_i32, %c0_i32_0 : i32, i32
  }
  func.func @transform_3(%arg0: i32) -> (i32, i32) {
    %c0_i32 = arith.constant 0 : i32
    %c0_i32_0 = arith.constant 0 : i32
    %c0_i32_1 = arith.constant 0 : i32
    return %c0_i32, %c0_i32_0 : i32, i32
  }
  func.func @transform_4(%arg0: i32) -> (i32, i32) {
    %c0_i32 = arith.constant 0 : i32
    %c0_i32_0 = arith.constant 0 : i32
    %c0_i32_1 = arith.constant 0 : i32
    return %c0_i32, %c0_i32_0 : i32, i32
  }
  func.func @transform_5(%arg0: i32) -> (i32, i32, i32) {
    %c0_i32 = arith.constant 0 : i32
    %c0_i32_0 = arith.constant 0 : i32
    %c0_i32_1 = arith.constant 0 : i32
    return %arg0, %c0_i32, %c0_i32_0 : i32, i32, i32
  }
}

module attributes {stable_mosaic.version = 11 : i64} {
  func.func @_attention_kernel(%arg0: i32, %arg1: memref<2x8x128xf32, #tpu.memory_space<vmem>>, %arg2: memref<128x384xbf16, #tpu.memory_space<vmem>>, %arg3: memref<1x384xf32, #tpu.memory_space<vmem>>, %arg4: memref<1x128xf32, #tpu.memory_space<vmem>>, %arg5: memref<1x128xf32, #tpu.memory_space<vmem>>, %arg6: memref<2x8x128xf32, #tpu.memory_space<vmem>>, %arg7: memref<2x8x128xbf16, #tpu.memory_space<vmem>>, %arg8: memref<2x8x128xbf16, #tpu.memory_space<vmem>>) attributes {dimension_semantics = [#tpu.dimension_semantics<parallel>], iteration_bounds = array<i64: 1>, scalar_prefetch = 0 : i64, scratch_operands = 2 : i64, tpu.core_type = #tpu.core_type<tc>, window_params = [{transform_indices = @transform_0, window_bounds = array<i64: 2, 8, 128>}, {pipeline_mode = #tpu.pipeline_mode<synchronous>, transform_indices = @transform_1, window_bounds = array<i64: 128, 384>}, {pipeline_mode = #tpu.pipeline_mode<synchronous>, transform_indices = @transform_2, window_bounds = array<i64: 1, 384>}, {pipeline_mode = #tpu.pipeline_mode<synchronous>, transform_indices = @transform_3, window_bounds = array<i64: 1, 128>}, {pipeline_mode = #tpu.pipeline_mode<synchronous>, transform_indices = @transform_4, window_bounds = array<i64: 1, 128>}, {transform_indices = @transform_5, window_bounds = array<i64: 2, 8, 128>}]} {
    %c0 = arith.constant 0 : index
    %c0_0 = arith.constant 0 : index
    %c0_1 = arith.constant 0 : index
    %0 = vector.load %arg1[%c0, %c0_0, %c0_1] : memref<2x8x128xf32, #tpu.memory_space<vmem>>, vector<2x8x128xf32>
    %1 = vector.shape_cast %0 : vector<2x8x128xf32> to vector<16x128xf32>
    %2 = arith.truncf %1 : vector<16x128xf32> to vector<16x128xbf16>
    %c0_2 = arith.constant 0 : index
    %c0_3 = arith.constant 0 : index
    %3 = vector.load %arg2[%c0_2, %c0_3] : memref<128x384xbf16, #tpu.memory_space<vmem>>, vector<128x384xbf16>
    %cst = arith.constant dense<0.000000e+00> : vector<16x384xf32>
    %4 = tpu.matmul %2, %3, %cst {dimension_numbers = #tpu.dot_dimension_numbers<[1], [0], [0], [1], [0, 0, 1, 1], [], []>} : vector<16x128xbf16>, vector<128x384xbf16>, vector<16x384xf32> -> vector<16x384xf32>
    %c0_4 = arith.constant 0 : index
    %c0_5 = arith.constant 0 : index
    %5 = vector.load %arg3[%c0_4, %c0_5] : memref<1x384xf32, #tpu.memory_space<vmem>>, vector<1x384xf32>
    %6 = vector.broadcast %5 : vector<1x384xf32> to vector<16x384xf32>
    %7 = arith.addf %4, %6 : vector<16x384xf32>
    %8 = vector.extract_strided_slice %7 {offsets = [0, 0], sizes = [16, 128], strides = [1, 1]} : vector<16x384xf32> to vector<16x128xf32>
    %9 = vector.shape_cast %8 : vector<16x128xf32> to vector<2x8x128xf32>
    %10 = arith.truncf %9 : vector<2x8x128xf32> to vector<2x8x128xbf16>
    %11 = vector.extract_strided_slice %7 {offsets = [0, 128], sizes = [16, 128], strides = [1, 1]} : vector<16x384xf32> to vector<16x128xf32>
    %12 = vector.shape_cast %11 : vector<16x128xf32> to vector<2x8x128xf32>
    %13 = arith.truncf %12 : vector<2x8x128xf32> to vector<2x8x128xbf16>
    %c0_6 = arith.constant 0 : index
    %c0_7 = arith.constant 0 : index
    %c0_8 = arith.constant 0 : index
    %14 = vector.load %arg7[%c0_6, %c0_7, %c0_8] : memref<2x8x128xbf16, #tpu.memory_space<vmem>>, vector<2x8x128xbf16>
    tpu.vector_store %arg7[%c0_6, %c0_7, %c0_8], %13 {strides = array<i32>} : memref<2x8x128xbf16, #tpu.memory_space<vmem>>, vector<2x8x128xbf16>,
    %15 = vector.extract_strided_slice %7 {offsets = [0, 256], sizes = [16, 128], strides = [1, 1]} : vector<16x384xf32> to vector<16x128xf32>
    %16 = vector.shape_cast %15 : vector<16x128xf32> to vector<2x8x128xf32>
    %17 = arith.truncf %16 : vector<2x8x128xf32> to vector<2x8x128xbf16>
    %c0_9 = arith.constant 0 : index
    %c0_10 = arith.constant 0 : index
    %c0_11 = arith.constant 0 : index
    %18 = vector.load %arg8[%c0_9, %c0_10, %c0_11] : memref<2x8x128xbf16, #tpu.memory_space<vmem>>, vector<2x8x128xbf16>
    tpu.vector_store %arg8[%c0_9, %c0_10, %c0_11], %17 {strides = array<i32>} : memref<2x8x128xbf16, #tpu.memory_space<vmem>>, vector<2x8x128xbf16>,
    %19 = tpu.iota {dimensions = array<i32: 1>} : vector<1x8x8xi32>
    %20 = tpu.iota {dimensions = array<i32: 2>} : vector<1x8x8xi32>
    %cst_12 = arith.constant -1.000000e+30 : f32
    %21 = vector.broadcast %cst_12 : f32 to vector<2x8x1xf32>
    %cst_13 = arith.constant 0.000000e+00 : f32
    %22 = vector.broadcast %cst_13 : f32 to vector<2x8x1xf32>
    %cst_14 = arith.constant 0.000000e+00 : f32
    %23 = vector.broadcast %cst_14 : f32 to vector<2x8x128xf32>
    %c0_15 = arith.constant 0 : index
    %c0_16 = arith.constant 0 : index
    %c0_17 = arith.constant 0 : index
    %24 = vector.load %arg7[%c0_15, %c0_16, %c0_17] : memref<2x8x128xbf16, #tpu.memory_space<vmem>>, vector<2x8x128xbf16>
    %c0_18 = arith.constant 0 : index
    %c0_19 = arith.constant 0 : index
    %c0_20 = arith.constant 0 : index
    %25 = vector.load %arg8[%c0_18, %c0_19, %c0_20] : memref<2x8x128xbf16, #tpu.memory_space<vmem>>, vector<2x8x128xbf16>
    %cst_21 = arith.constant dense<0.000000e+00> : vector<2x8x8xf32>
    %26 = tpu.matmul %10, %24, %cst_21 {dimension_numbers = #tpu.dot_dimension_numbers<[2], [2], [1], [1], [0, 0, 0, 1, 1, 1], [0], [0]>} : vector<2x8x128xbf16>, vector<2x8x128xbf16>, vector<2x8x8xf32> -> vector<2x8x8xf32>
    %c0_i32 = arith.constant 0 : i32
    %27 = vector.broadcast %c0_i32 : i32 to vector<1x8x8xi32>
    %28 = arith.addi %27, %20 : vector<1x8x8xi32>
    %29 = arith.cmpi sle, %28, %19 : vector<1x8x8xi32>
    %cst_22 = arith.constant -1.000000e+30 : f32
    %30 = vector.shape_cast %29 : vector<1x8x8xi1> to vector<1x8x8xi1>
    %31 = vector.broadcast %30 : vector<1x8x8xi1> to vector<2x8x8xi1>
    %32 = vector.broadcast %cst_22 : f32 to vector<2x8x8xf32>
    %33 = arith.select %31, %26, %32 : vector<2x8x8xi1>, vector<2x8x8xf32>
    %cst_23 = arith.constant dense<0xFF800000> : vector<2x8xf32>
    %34 = vector.multi_reduction <maximumf>, %33, %cst_23 [2] : vector<2x8x8xf32> to vector<2x8xf32>
    %35 = vector.shape_cast %34 : vector<2x8xf32> to vector<2x8x1xf32>
    %36 = arith.maximumf %21, %35 : vector<2x8x1xf32>
    %37 = arith.subf %21, %36 : vector<2x8x1xf32>
    %38 = math.exp %37 : vector<2x8x1xf32>
    %39 = vector.broadcast %36 : vector<2x8x1xf32> to vector<2x8x8xf32>
    %40 = arith.subf %33, %39 : vector<2x8x8xf32>
    %41 = math.exp %40 : vector<2x8x8xf32>
    %cst_24 = arith.constant dense<0.000000e+00> : vector<2x8xf32>
    %42 = vector.multi_reduction <add>, %41, %cst_24 [2] : vector<2x8x8xf32> to vector<2x8xf32>
    %43 = vector.shape_cast %42 : vector<2x8xf32> to vector<2x8x1xf32>
    %44 = arith.truncf %41 : vector<2x8x8xf32> to vector<2x8x8xbf16>
    %cst_25 = arith.constant dense<0.000000e+00> : vector<2x8x128xf32>
    %45 = tpu.matmul %44, %25, %cst_25 {dimension_numbers = #tpu.dot_dimension_numbers<[2], [1], [1], [2], [0, 0, 0, 1, 1, 2], [0], [0]>} : vector<2x8x8xbf16>, vector<2x8x128xbf16>, vector<2x8x128xf32> -> vector<2x8x128xf32>
    %46 = arith.mulf %38, %22 : vector<2x8x1xf32>
    %47 = arith.addf %46, %43 : vector<2x8x1xf32>
    %48 = vector.broadcast %38 : vector<2x8x1xf32> to vector<2x8x128xf32>
    %49 = arith.mulf %48, %23 : vector<2x8x128xf32>
    %50 = arith.addf %49, %45 : vector<2x8x128xf32>
    %51 = tpu.reciprocal %47 {approx = true} : vector<2x8x1xf32> -> vector<2x8x1xf32>
    %52 = arith.mulf %47, %51 : vector<2x8x1xf32>
    %cst_26 = arith.constant 2.000000e+00 : f32
    %53 = vector.broadcast %cst_26 : f32 to vector<2x8x1xf32>
    %54 = arith.subf %53, %52 : vector<2x8x1xf32>
    %55 = arith.mulf %51, %54 : vector<2x8x1xf32>
    %56 = vector.broadcast %55 : vector<2x8x1xf32> to vector<2x8x128xf32>
    %57 = arith.mulf %50, %56 : vector<2x8x128xf32>
    %58 = arith.addf %57, %0 : vector<2x8x128xf32>
    %cst_27 = arith.constant dense<0.000000e+00> : vector<2x8xf32>
    %59 = vector.multi_reduction <add>, %58, %cst_27 [2] : vector<2x8x128xf32> to vector<2x8xf32>
    %60 = vector.shape_cast %59 : vector<2x8xf32> to vector<2x8x1xf32>
    %cst_28 = arith.constant 3.125000e-02 : f32
    %61 = vector.broadcast %cst_28 : f32 to vector<2x8x1xf32>
    %62 = arith.mulf %60, %61 : vector<2x8x1xf32>
    %63 = tpu.iota {dimensions = array<i32: 2>} : vector<1x1x128xi32>
    %c32_i32 = arith.constant 32 : i32
    %64 = vector.broadcast %c32_i32 : i32 to vector<1x1x128xi32>
    %65 = arith.cmpi slt, %63, %64 : vector<1x1x128xi32>
    %66 = vector.broadcast %62 : vector<2x8x1xf32> to vector<2x8x128xf32>
    %67 = arith.subf %58, %66 : vector<2x8x128xf32>
    %cst_29 = arith.constant 0.000000e+00 : f32
    %68 = vector.shape_cast %65 : vector<1x1x128xi1> to vector<1x1x128xi1>
    %69 = vector.broadcast %68 : vector<1x1x128xi1> to vector<2x8x128xi1>
    %70 = vector.broadcast %cst_29 : f32 to vector<2x8x128xf32>
    %71 = arith.select %69, %67, %70 : vector<2x8x128xi1>, vector<2x8x128xf32>
    %72 = arith.mulf %71, %71 : vector<2x8x128xf32>
    %cst_30 = arith.constant dense<0.000000e+00> : vector<2x8xf32>
    %73 = vector.multi_reduction <add>, %72, %cst_30 [2] : vector<2x8x128xf32> to vector<2x8xf32>
    %74 = vector.shape_cast %73 : vector<2x8xf32> to vector<2x8x1xf32>
    %cst_31 = arith.constant 3.125000e-02 : f32
    %75 = vector.broadcast %cst_31 : f32 to vector<2x8x1xf32>
    %76 = arith.mulf %74, %75 : vector<2x8x1xf32>
    %cst_32 = arith.constant 9.99999974E-6 : f32
    %77 = vector.broadcast %cst_32 : f32 to vector<2x8x1xf32>
    %78 = arith.addf %76, %77 : vector<2x8x1xf32>
    %79 = math.rsqrt %78 : vector<2x8x1xf32>
    %80 = vector.broadcast %79 : vector<2x8x1xf32> to vector<2x8x128xf32>
    %81 = arith.mulf %71, %80 : vector<2x8x128xf32>
    %c0_33 = arith.constant 0 : index
    %c0_34 = arith.constant 0 : index
    %82 = vector.load %arg4[%c0_33, %c0_34] : memref<1x128xf32, #tpu.memory_space<vmem>>, vector<1x128xf32>
    %83 = vector.shape_cast %82 : vector<1x128xf32> to vector<1x1x128xf32>
    %84 = vector.broadcast %83 : vector<1x1x128xf32> to vector<2x8x128xf32>
    %85 = arith.mulf %81, %84 : vector<2x8x128xf32>
    %c0_35 = arith.constant 0 : index
    %c0_36 = arith.constant 0 : index
    %86 = vector.load %arg5[%c0_35, %c0_36] : memref<1x128xf32, #tpu.memory_space<vmem>>, vector<1x128xf32>
    %87 = vector.shape_cast %86 : vector<1x128xf32> to vector<1x1x128xf32>
    %88 = vector.broadcast %87 : vector<1x1x128xf32> to vector<2x8x128xf32>
    %89 = arith.addf %85, %88 : vector<2x8x128xf32>
    %c0_37 = arith.constant 0 : index
    %c0_38 = arith.constant 0 : index
    %c0_39 = arith.constant 0 : index
    %90 = vector.load %arg6[%c0_37, %c0_38, %c0_39] : memref<2x8x128xf32, #tpu.memory_space<vmem>>, vector<2x8x128xf32>
    tpu.vector_store %arg6[%c0_37, %c0_38, %c0_39], %89 {strides = array<i32>} : memref<2x8x128xf32, #tpu.memory_space<vmem>>, vector<2x8x128xf32>,
    return
  }
  func.func @transform_0(%arg0: i32) -> (i32, i32, i32) {
    %c0_i32 = arith.constant 0 : i32
    %c0_i32_0 = arith.constant 0 : i32
    %c0_i32_1 = arith.constant 0 : i32
    return %arg0, %c0_i32, %c0_i32_0 : i32, i32, i32
  }
  func.func @transform_1(%arg0: i32) -> (i32, i32) {
    %c0_i32 = arith.constant 0 : i32
    %c0_i32_0 = arith.constant 0 : i32
    %c0_i32_1 = arith.constant 0 : i32
    return %c0_i32, %c0_i32_0 : i32, i32
  }
  func.func @transform_2(%arg0: i32) -> (i32, i32) {
    %c0_i32 = arith.constant 0 : i32
    %c0_i32_0 = arith.constant 0 : i32
    %c0_i32_1 = arith.constant 0 : i32
    return %c0_i32, %c0_i32_0 : i32, i32
  }
  func.func @transform_3(%arg0: i32) -> (i32, i32) {
    %c0_i32 = arith.constant 0 : i32
    %c0_i32_0 = arith.constant 0 : i32
    %c0_i32_1 = arith.constant 0 : i32
    return %c0_i32, %c0_i32_0 : i32, i32
  }
  func.func @transform_4(%arg0: i32) -> (i32, i32) {
    %c0_i32 = arith.constant 0 : i32
    %c0_i32_0 = arith.constant 0 : i32
    %c0_i32_1 = arith.constant 0 : i32
    return %c0_i32, %c0_i32_0 : i32, i32
  }
  func.func @transform_5(%arg0: i32) -> (i32, i32, i32) {
    %c0_i32 = arith.constant 0 : i32
    %c0_i32_0 = arith.constant 0 : i32
    %c0_i32_1 = arith.constant 0 : i32
    return %arg0, %c0_i32, %c0_i32_0 : i32, i32, i32
  }
}

</mosaic_0001>

<bundles_post_ra>
// kernel: tpu_custom_call.1
= control target key start
LH: loop header
LB: loop body
LE: loop exit
PB: predicated region body
PF: predicated region fallthrough
CT: control target
= control target key end

     0   :  { %10 = vsyncpa [#allocation5], 0  ;;  %s839_s0 = inlined_call_operand.hbm [shape: f32[2,8,128], index: 0, kind: input, shape index: {}]   ;;  %s840_s1 = inlined_call_operand.hbm [shape: bf16[128,384], index: 1, kind: input, shape index: {}]   ;;  %s841_s2 = inlined_call_operand.hbm [shape: f32[1,384], index: 2, kind: input, shape index: {}]   ;;  %s842_s3 = inlined_call_operand.vmem [shape: f32[1,128], index: 3, kind: input, shape index: {}]   ;;  %s843_s4 = inlined_call_operand.vmem [shape: f32[1,128], index: 4, kind: input, shape index: {}]   ;;  %s844_s5 = inlined_call_operand.hbm [shape: f32[2,8,128], index: 5, kind: output, shape index: {}]  }
   0x1   :  { %11 = vsyncpa [#allocation8], 0  ;;  %s30_s20 = sshll.u32 %s840_s1, 4  ;;  %s31_s20 = int_to_ptr.hbm [resolvable:$true] %s30_s20 }
   0x2   :  { %12 = vsyncpa [#allocation6], 0  ;;  %s754_s21 = smov [#allocation7]   ;;  %s17_s25 = sshll.u32 %s839_s0, 4  ;;  %s18_s25 = int_to_ptr.hbm [resolvable:$true] %s17_s25 }
   0x3   :  { %s32_s22 = sshll.u32 %s754_s21, 4  ;;  %s755_s26 = smov 192   ;;  %s33_s22 = int_to_ptr.vmem [resolvable:$true] %s32_s22 }
   0x4   :  { %s756_s27 = smov 12   ;;  %s757_s28 = smov [#allocation4]  }
   0x5   :  { %38 = dma.hbm_to_vmem [thread:$0]  %s31_s20, 3072, %s33_s22, [#allocation8], %s755_s26, %s755_s26, %s756_s27  }
   0x6   :  { %s19_s29 = sshll.u32 %s757_s28, 4  ;;  %s758_s30 = smov 128   ;;  %s20_s29 = int_to_ptr.vmem [resolvable:$true] %s19_s29 }
   0x7   :  { %s759_s6 = smov 8   ;;  %s44_s8 = sshll.u32 %s841_s2, 4  ;;  %s45_s8 = int_to_ptr.hbm [resolvable:$true] %s44_s8 }
   0x8   :  { %25 = dma.hbm_to_vmem [thread:$0]  %s18_s25, 256, %s20_s29, [#allocation5], %s758_s30, %s758_s30, %s759_s6  }
   0x9   :  { %s760_s9 = smov [#allocation9]  }
   0xa   :  { %s46_s0 = sshll.u32 %s760_s9, 4  ;;  %s47_s0 = int_to_ptr.vmem [resolvable:$true] %s46_s0 }
   0xb   :  { %49 = dma.hbm_to_vmem [thread:$0]  %s45_s8, 48, %s47_s0, [#allocation8]  }
   0xc   :  { %748 = dma.done.wait [#allocation5], 256  }
   0xd   :  { %749 = vsyncadd [#allocation5], 4294967040 }
   0xe   :  { %750 = dma.done.wait [#allocation8], 3120  }
   0xf   :  { %751 = vsyncadd [#allocation8], 4294964176  ;;  %v613_v0 = vld [vmem:[#allocation7 + $0xac] sm:$0xf]  ;;  %v582_v1 = vld [vmem:[#allocation7 + $0xb4] sm:$0xf0] }
  0x10   :  { %v610_v2 = vld [vmem:[#allocation7 + $0x94] sm:$0xf]  ;;  %v585_v3 = vor.u32 %v613_v0, %v582_v1  ;;  %v570_v4 = vld [vmem:[#allocation7 + $0x9c] sm:$0xf0]  ;;  %v580_v5 = vld [vmem:[#allocation7 + $0xa8] sm:$0xf] }
  0x11   :  { %v573_v6 = vor.u32 %v610_v2, %v570_v4  ;;  %v607_v7 = vld [vmem:[#allocation7 + $0x7c] sm:$0xf]  ;;  %v614_v8 = vld [vmem:[#allocation7 + $0xb0] sm:$0xf0]  ;;  %v558_v9 = vld [vmem:[#allocation7 + $0x84] sm:$0xf0] }
  0x12   :  { %252 = vmatpush.bf16.msra.mxu1 %v585_v3  ;;  %v581_v10 = vor.u32 %v614_v8, %v580_v5  ;;  %v568_v11 = vld [vmem:[#allocation7 + $0x90] sm:$0xf]  ;;  %v611_v12 = vld [vmem:[#allocation7 + $0x98] sm:$0xf0]  ;;  %v561_v14 = vor.u32 %v607_v7, %v558_v9  ;;  %v556_v15 = vld [vmem:[#allocation7 + $0x78] sm:$0xf] }
  0x13   :  { %v569_v13 = vor.u32 %v611_v12, %v568_v11  ;;  %v608_v16 = vld [vmem:[#allocation7 + $0x80] sm:$0xf0]  ;;  %v546_v18 = vld [vmem:[#allocation7 + $0x6c] sm:$0xf0]  ;;  %v544_v21 = vld [vmem:[#allocation7 + $0x60] sm:$0xf] }
  0x14   :  { %238 = vmatpush.bf16.msra.mxu0 %v581_v10  ;;  %v604_v17 = vld [vmem:[#allocation7 + $0x64] sm:$0xf]  ;;  %v557_v19 = vor.u32 %v608_v16, %v556_v15  ;;  %v605_v22 = vld [vmem:[#allocation7 + $0x68] sm:$0xf0]  ;;  %v534_v24 = vld [vmem:[#allocation7 + $0x54] sm:$0xf0] }
  0x15   :  { %v549_v20 = vor.u32 %v604_v17, %v546_v18  ;;  %v601_v23 = vld [vmem:[#allocation7 + $0x4c] sm:$0xf]  ;;  %v545_v25 = vor.u32 %v605_v22, %v544_v21  ;;  %v532_v27 = vld [vmem:[#allocation7 + $0x48] sm:$0xf]  ;;  %v602_v28 = vld [vmem:[#allocation7 + $0x50] sm:$0xf0] }
  0x16   :  { %253 = vmatpush.bf16.msra.mxu1 %v573_v6  ;;  %v537_v26 = vor.u32 %v601_v23, %v534_v24  ;;  %v598_v29 = vld [vmem:[#allocation7 + $0x34] sm:$0xf]  ;;  %v522_v30 = vld [vmem:[#allocation7 + $0x3c] sm:$0xf0]  ;;  %v533_v31 = vor.u32 %v602_v28, %v532_v27  ;;  %v520_v33 = vld [vmem:[#allocation7 + $0x30] sm:$0xf]  ;;  %v290_v27 = vlaneseq }
  0x17   :  { %v525_v32 = vor.u32 %v598_v29, %v522_v30  ;;  %v599_v34 = vld [vmem:[#allocation7 + $0x38] sm:$0xf0]  ;;  %v510_v36 = vld [vmem:[#allocation7 + $0x24] sm:$0xf0]  ;;  %v508_v39 = vld [vmem:[#allocation7 + $0x18] sm:$0xf] }
  0x18   :  { %239 = vmatpush.bf16.msra.mxu0 %v569_v13  ;;  %v595_v35 = vld [vmem:[#allocation7 + $0x1c] sm:$0xf]  ;;  %v521_v37 = vor.u32 %v599_v34, %v520_v33  ;;  %v596_v40 = vld [vmem:[#allocation7 + $0x20] sm:$0xf0]  ;;  %v498_v42 = vld [vmem:[#allocation7 + $0xc] sm:$0xf0] }
  0x19   :  { %v513_v38 = vor.u32 %v595_v35, %v510_v36  ;;  %v592_v41 = vld [vmem:[#allocation7 + $0x4] sm:$0xf]  ;;  %v804_v43 = vld [vmem:[#allocation4] sm:$0xff]  ;;  %v509_v44 = vor.u32 %v596_v40, %v508_v39  ;;  %v806_v46 = vld [vmem:[#allocation4 + $0x8] sm:$0xff]  ;;  %v291_v28 = vshrl.u32 %v290_v27, 7  ;;  %v814_v29 = vand.u32 127, %v290_v27 }
  0x1a   :  { %254 = vmatpush.bf16.msra.mxu1 %v561_v14  ;;  %v501_v45 = vor.u32 %v592_v41, %v498_v42  ;;  %v496_v47 = vld [vmem:[#allocation7] sm:$0xf]  ;;  %v593_v48 = vld [vmem:[#allocation7 + $0x8] sm:$0xf0]  ;;  %v69_v49 = vpack.c.bf16 %v806_v46, %v804_v43  ;;  %v588_v58 = vld [vmem:[#allocation7 + $0xb0] sm:$0xf] }
  0x1b   :  { %v497_v50 = vor.u32 %v593_v48, %v496_v47  ;;  %v810_v52 = vld [vmem:[#allocation9] sm:$0x7]  ;;  %v615_v59 = vld [vmem:[#allocation7 + $0xb8] sm:$0xf0]  ;;  %v576_v60 = vld [vmem:[#allocation7 + $0x98] sm:$0xf]  ;;  %vm324_vm0 = vcmp.le.s32.totalorder %v814_v29, %v291_v28 }
  0x1c   :  { %240 = vmatpush.bf16.msra.mxu0 %v557_v19  ;;  %v105_v53 = vperm.slane %v810_v52, 1  ;;  %v589_v61 = vor.u32 %v615_v59, %v588_v58  ;;  %v612_v62 = vld [vmem:[#allocation7 + $0xa0] sm:$0xf0]  ;;  %v104_v0 = vperm.slane %v810_v52, 0  ;;  %v564_v1 = vld [vmem:[#allocation7 + $0x80] sm:$0xf] }
  0x1d   :  { %v577_v63 = vor.u32 %v612_v62, %v576_v60  ;;  %v609_v2 = vld [vmem:[#allocation7 + $0x88] sm:$0xf0]  ;;  %v552_v5 = vld [vmem:[#allocation7 + $0x68] sm:$0xf]  ;;  %v606_v9 = vld [vmem:[#allocation7 + $0x70] sm:$0xf0] }
  0x1e   :  { %255 = vmatpush.bf16.msra.mxu1 %v549_v20  ;;  %266 = vmatpush.bf16.msra.mxu2 %v589_v61  ;;  %v565_v4 = vor.u32 %v609_v2, %v564_v1  ;;  %v553_v10 = vor.u32 %v606_v9, %v552_v5  ;;  %v540_v12 = vld [vmem:[#allocation7 + $0x50] sm:$0xf]  ;;  %v603_v13 = vld [vmem:[#allocation7 + $0x58] sm:$0xf0]  ;;  %v528_v15 = vld [vmem:[#allocation7 + $0x38] sm:$0xf] }
  0x1f   :  { %v541_v14 = vor.u32 %v603_v13, %v540_v12  ;;  %v600_v16 = vld [vmem:[#allocation7 + $0x40] sm:$0xf0]  ;;  %v516_v18 = vld [vmem:[#allocation7 + $0x20] sm:$0xf]  ;;  %v597_v19 = vld [vmem:[#allocation7 + $0x28] sm:$0xf0] }
  0x20   :  { %241 = vmatpush.bf16.msra.mxu0 %v545_v25  ;;  %v529_v17 = vor.u32 %v600_v16, %v528_v15  ;;  %v517_v21 = vor.u32 %v597_v19, %v516_v18  ;;  %v504_v22 = vld [vmem:[#allocation7 + $0x8] sm:$0xf]  ;;  %v594_v23 = vld [vmem:[#allocation7 + $0x10] sm:$0xf0]  ;;  %vm329_vm1 = vcmask 64512   ;;  %vm361_vm2 = vcmask 1043456  }
  0x21   :  { %v505_v25 = vor.u32 %v594_v23, %v504_v22  ;;  %vm421_vm3 = vcmp.lt.s32.totalorder %v814_v29, 32  ;;  %s480_s16 = sshll.u32 %s844_s5, 4  ;;  %s481_s16 = int_to_ptr.hbm [resolvable:$true] %s480_s16 }
  0x22   :  { %256 = vmatpush.bf16.msra.mxu1 %v537_v26  ;;  %267 = vmatpush.bf16.msra.mxu2 %v577_v63 }
  0x24   :  { %242 = vmatpush.bf16.msra.mxu0 %v533_v31 }
  0x26   :  { %257 = vmatpush.bf16.msra.mxu1 %v525_v32  ;;  %268 = vmatpush.bf16.msra.mxu2 %v565_v4 }
  0x28   :  { %243 = vmatpush.bf16.msra.mxu0 %v521_v37 }
  0x2a   :  { %258 = vmatpush.bf16.msra.mxu1 %v513_v38  ;;  %269 = vmatpush.bf16.msra.mxu2 %v553_v10  ;;  %v106_v38 = vperm.slane %v810_v52, 2 }
  0x2c   :  { %244 = vmatpush.bf16.msra.mxu0 %v509_v44 }
  0x2e   :  { %259 = vmatpush.bf16.msra.mxu1 %v501_v45  ;;  %270 = vmatpush.bf16.msra.mxu2 %v541_v14 }
  0x30   :  { %245 = vmatpush.bf16.msra.mxu0 %v497_v50 }
  0x31   :  { %260 = vmatmul.bf16.vlgmr.msra.gmra.mxu1 %v69_v49 }
  0x32   :  { %271 = vmatpush.bf16.msra.mxu2 %v529_v17 }
  0x33   :  { %246 = vmatmul.bf16.vlgmr.msra.gmra.mxu0 %v69_v49 }
  0x36   :  { %272 = vmatpush.bf16.msra.mxu2 %v517_v21 }
  0x3a   :  { %273 = vmatpush.bf16.msra.mxu2 %v505_v25 }
  0x3d   :  { %274 = vmatmul.bf16.vlgmr.msra.gmra.mxu2 %v69_v49 }
  0xae   :  { %v261_v51 = vpop.f32.mrf.mxu1 }
  0xaf   :  { %v262_v55 = vadd.f32 %v261_v51, %v105_v53 }
  0xb0   :  { %v247_v3 = vpop.f32.mrf.mxu0 }
  0xb1   :  { %v248_v6 = vadd.f32 %v247_v3, %v104_v0 }
  0xb3   :  { %v280_v11 = vpack.c.bf16 %v248_v6, %v248_v6 }
  0xb6   :  { %v263_v54 = vpop.f32.mrf.mxu1 }
  0xb7   :  { %v264_v56 = vadd.f32 %v263_v54, %v105_v53 }
  0xb8   :  { %v249_v20 = vpop.f32.mrf.mxu0 }
  0xb9   :  { %v619_v57 = vpack.c.bf16 %v264_v56, %v262_v55  ;;  %v250_v24 = vadd.f32 %v249_v20, %v104_v0 }
  0xbb   :  { %620 = vst [vmem:[#allocation2] sm:$0xff] %v619_v57   ;;  %v281_v26 = vpack.c.bf16 %v250_v24, %v250_v24 }
  0xc0   :  { %v275_v37 = vpop.f32.mrf.mxu2 }
  0xc1   :  { %v276_v40 = vadd.f32 %v275_v37, %v106_v38 }
  0xc2   :  { %v294_v7 = vld [vmem:[#allocation2] sm:$0xf]  ;;  %v295_v8 = vld [vmem:[#allocation2 + $0x4] sm:$0xf] }
  0xc3   :  { %305 = vmatpush.bf16.xpose.msra.mxu3 %v294_v7 }
  0xc8   :  { %v277_v41 = vpop.f32.mrf.mxu2 }
  0xc9   :  { %v278_v42 = vadd.f32 %v277_v41, %v106_v38 }
  0xca   :  { %306 = vmatmul.bf16.vlgmr.msra.gmra.mxu3 %v280_v11 }
  0xcb   :  { %318 = vmatpush.bf16.xpose.msrb.mxu3 %v295_v8  ;;  %v624_v44 = vpack.c.bf16 %v278_v42, %v276_v40 }
  0xcd   :  { %625 = vst [vmem:[#allocation3] sm:$0xff] %v624_v44  }
  0xd4   :  { %v296_v45 = vld [vmem:[#allocation3] sm:$0xf]  ;;  %v297_v47 = vld [vmem:[#allocation3 + $0x4] sm:$0xf] }
  0xd5   :  { %v363_v48 = vsel %vm361_vm2, %v296_v45, 0  ;;  %v382_v49 = vsel %vm361_vm2, %v297_v47, 0 }
  0xd6   :  { %372 = vmatpush.bf16.msra.mxu3 %v363_v48  ;;  %391 = vmatpush.bf16.msrb.mxu0 %v382_v49 }
  0xda   :  { %319 = vmatmul.bf16.vlgmr.msrb.gmra.mxu3 %v281_v26 }
 0x14d   :  { %v307_v30 = vpop.f32.mrf.mxu3 }
 0x14e   :  { %v327_v31 = vsel %vm324_vm0, %v307_v30, -1e+30 }
 0x14f   :  { %v330_v32 = vsel %vm329_vm1, %v327_v31, -inf }
 0x150   :  { %331 = vmax.xlane.f32.xlu0 %v330_v32 }
 0x155   :  { %v309_v33 = vpop.f32.mrf.mxu3 }
 0x15d   :  { %v320_v34 = vpop.f32.mrf.mxu3 }
 0x15e   :  { %v328_v35 = vsel %vm324_vm0, %v320_v34, -1e+30 }
 0x15f   :  { %v333_v36 = vsel %vm329_vm1, %v328_v35, -inf }
 0x160   :  { %334 = vmax.xlane.f32.xlu0 %v333_v36 }
 0x165   :  { %v322_v39 = vpop.f32.mrf.mxu3 }
 0x1c3   :  { %v332_v50 = vpop.xlane.xlu0 %331 }
 0x1c4   :  { %v336_v51 = vmax.f32 %v332_v50, -1e+30 }
 0x1c6   :  { %v344_v53 = vsub.f32 %v327_v31, %v336_v51  ;;  %v338_v0 = vsub.f32 -1e+30, %v336_v51 }
 0x1c8   :  { %v346_v54 = vmul.f32 1.442695, %v344_v53  ;;  %v340_v1 = vmul.f32 1.442695, %v338_v0  ;;  %v634_v53 = vld [vmem:[%s842_s3] ss:$0 sm:$0xff] }
 0x1c9   :  { %s761_s3 = smov [#allocation10]  }
 0x1ca   :  { %636 = vpow2.f32 %v346_v54  ;;  %s478_s13 = sshll.u32 %s761_s3, 4  ;;  %s479_s13 = int_to_ptr.vmem [resolvable:$true] %s478_s13 }
 0x1d0   :  { %v637_v55 = vpop.eup %636 }
 0x1d1   :  { %v356_v52 = vpack.c.bf16 %v637_v55, %v637_v55  ;;  %v350_v56 = vsel %vm329_vm1, %v637_v55, 0.0 }
 0x1d2   :  { %351 = vadd.xlane.f32.xlu1 %v350_v56  ;;  %v635_v56 = vld [vmem:[%s843_s4] ss:$0 sm:$0xff] }
 0x1d3   :  { %v335_v57 = vpop.xlane.xlu0 %334  ;;  %590 = vmatmul.msk.bf16.vlgmr.msra.gmra.mxu3 %vm329_vm1, %v356_v52 }
 0x1d4   :  { %v337_v58 = vmax.f32 %v335_v57, -1e+30 }
 0x1d6   :  { %v345_v59 = vsub.f32 %v328_v35, %v337_v58  ;;  %v339_v3 = vsub.f32 -1e+30, %v337_v58 }
 0x1d8   :  { %v348_v60 = vmul.f32 1.442695, %v345_v59  ;;  %v342_v7 = vmul.f32 1.442695, %v339_v3 }
 0x1da   :  { %638 = vpow2.f32 %v348_v60 }
 0x1db   :  { %640 = vpow2.f32 %v340_v1 }
 0x1e0   :  { %v639_v61 = vpop.eup %638 }
 0x1e1   :  { %v353_v62 = vsel %vm329_vm1, %v639_v61, 0.0  ;;  %v357_v63 = vpack.c.bf16 %v639_v61, %v639_v61  ;;  %v641_v2 = vpop.eup %640 }
 0x1e2   :  { %354 = vadd.xlane.f32.xlu1 %v353_v62  ;;  %v397_v4 = vmul.f32 0.0, %v641_v2 }
 0x1e3   :  { %591 = vmatmul.msk.bf16.vlgmr.msrb.gmra.mxu0 %vm329_vm1, %v357_v63 }
 0x245   :  { %v352_v5 = vpop.xlane.xlu1 %351 }
 0x246   :  { %v399_v6 = vadd.f32 %v397_v4, %v352_v5 }
 0x248   :  { %642 = vrcp.f32 %v399_v6 }
 0x249   :  { %644 = vpow2.f32 %v342_v7 }
 0x24e   :  { %v643_v8 = vpop.eup %642 }
 0x24f   :  { %v405_v9 = vmul.f32 %v643_v8, %v399_v6  ;;  %v645_v10 = vpop.eup %644 }
 0x250   :  { %v398_v12 = vmul.f32 0.0, %v645_v10 }
 0x251   :  { %v407_v11 = vsub.f32 2.0, %v405_v9 }
 0x253   :  { %v409_v17 = vmul.f32 %v643_v8, %v407_v11 }
 0x255   :  { %v355_v13 = vpop.xlane.xlu1 %354 }
 0x256   :  { %v400_v14 = vadd.f32 %v398_v12, %v355_v13  ;;  %v374_v15 = vpop.f32.mrf.mxu3 }
 0x257   :  { %v401_v16 = vadd.f32 %v397_v4, %v374_v15 }
 0x258   :  { %646 = vrcp.f32 %v400_v14 }
 0x259   :  { %v411_v18 = vmul.f32 %v409_v17, %v401_v16 }
 0x25b   :  { %v413_v19 = vadd.f32 %v411_v18, %v804_v43 }
 0x25d   :  { %415 = vadd.xlane.f32.xlu2 %v413_v19 }
 0x25e   :  { %v647_v20 = vpop.eup %646  ;;  %v376_v21 = vpop.f32.mrf.mxu3 }
 0x25f   :  { %v406_v22 = vmul.f32 %v647_v20, %v400_v14 }
 0x260   :  { %v393_v23 = vpop.f32.mrf.mxu0 }
 0x261   :  { %v408_v24 = vsub.f32 2.0, %v406_v22  ;;  %v402_v25 = vadd.f32 %v398_v12, %v393_v23 }
 0x263   :  { %v410_v26 = vmul.f32 %v647_v20, %v408_v24 }
 0x265   :  { %v412_v27 = vmul.f32 %v410_v26, %v402_v25 }
 0x267   :  { %v414_v28 = vadd.f32 %v412_v27, %v806_v46 }
 0x268   :  { %v395_v30 = vpop.f32.mrf.mxu0 }
 0x269   :  { %417 = vadd.xlane.f32.xlu2 %v414_v28 }
 0x2d0   :  { %v416_v31 = vpop.xlane.xlu2 %415 }
 0x2d1   :  { %v419_v32 = vmul.f32 0.03125, %v416_v31 }
 0x2d3   :  { %v422_v33 = vsub.f32 %v413_v19, %v419_v32 }
 0x2d5   :  { %v426_v34 = vsel %vm421_vm3, %v422_v33, 0.0 }
 0x2d6   :  { %v428_v43 = vmul.f32 %v426_v34, %v426_v34 }
 0x2d8   :  { %430 = vadd.xlane.f32.xlu0 %v428_v43 }
 0x2dc   :  { %v418_v35 = vpop.xlane.xlu2 %417 }
 0x2dd   :  { %v420_v36 = vmul.f32 0.03125, %v418_v35 }
 0x2df   :  { %v423_v37 = vsub.f32 %v414_v28, %v420_v36 }
 0x2e1   :  { %v427_v38 = vsel %vm421_vm3, %v423_v37, 0.0 }
 0x2e2   :  { %v429_v39 = vmul.f32 %v427_v38, %v427_v38 }
 0x2e4   :  { %432 = vadd.xlane.f32.xlu1 %v429_v39 }
 0x34b   :  { %v431_v40 = vpop.xlane.xlu0 %430 }
 0x34c   :  { %v434_v41 = vmul.f32 0.03125, %v431_v40 }
 0x34e   :  { %v436_v42 = vadd.f32 1e-05, %v434_v41 }
 0x350   :  { %648 = vrsqrt.f32 %v436_v42  ;;  %vm444_vm5 = vweird.f32 %v436_v42 }
 0x356   :  { %v649_v46 = vpop.eup %648 }
 0x357   :  { %v439_v44 = vmul.f32 %v649_v46, %v436_v42  ;;  %v433_v45 = vpop.xlane.xlu1 %432  ;;  %vm445_vm4 = vweird.f32 %v649_v46 }
 0x358   :  { %v435_v47 = vmul.f32 0.03125, %v433_v45  ;;  %vm446_vm6 = vmor %vm444_vm5, %vm445_vm4 }
 0x359   :  { %v440_v48 = vmul.f32 %v649_v46, %v439_v44 }
 0x35a   :  { %v437_v29 = vadd.f32 1e-05, %v435_v47 }
 0x35b   :  { %v441_v49 = vmul.f32 0.5, %v440_v48 }
 0x35c   :  { %650 = vrsqrt.f32 %v437_v29  ;;  %vm454_vm8 = vweird.f32 %v437_v29 }
 0x35d   :  { %v442_v50 = vsub.f32 1.5, %v441_v49 }
 0x35f   :  { %v443_v51 = vmul.f32 %v649_v46, %v442_v50 }
 0x361   :  { %v447_v54 = vsel %vm446_vm6, %v649_v46, %v443_v51 }
 0x362   :  { %v651_v55 = vpop.eup %650  ;;  %v458_v52 = vmul.f32 %v447_v54, %v426_v34 }
 0x363   :  { %v449_v57 = vmul.f32 %v651_v55, %v437_v29  ;;  %vm455_vm7 = vweird.f32 %v651_v55 }
 0x364   :  { %v464_v58 = vmul.f32 %v634_v53, %v458_v52  ;;  %vm456_vm9 = vmor %vm454_vm8, %vm455_vm7 }
 0x365   :  { %v450_v59 = vmul.f32 %v651_v55, %v449_v57 }
 0x366   :  { %v470_v60 = vadd.f32 %v635_v56, %v464_v58 }
 0x367   :  { %v451_v61 = vmul.f32 0.5, %v450_v59 }
 0x368   :  { %472 = vst [vmem:[#allocation10] sm:$0xff] %v470_v60 }
 0x369   :  { %v452_v62 = vsub.f32 1.5, %v451_v61 }
 0x36b   :  { %v453_v63 = vmul.f32 %v651_v55, %v452_v62 }
 0x36d   :  { %v457_v0 = vsel %vm456_vm9, %v651_v55, %v453_v63 }
 0x36e   :  { %v459_v1 = vmul.f32 %v457_v0, %v427_v38 }
 0x370   :  { %v465_v2 = vmul.f32 %v634_v53, %v459_v1 }
 0x372   :  { %v471_v3 = vadd.f32 %v635_v56, %v465_v2 }
 0x374   :  { %473 = vst [vmem:[#allocation10 + $0x8] sm:$0xff] %v471_v3 }
 0x375   :  { %486 = dma.vmem_to_hbm [thread:$0]  %s479_s13, 256, %s481_s16, [#allocation6], %s758_s30, %s758_s30, %s759_s6  }
 0x376   :  { %752 = dma.done.wait [#allocation6], 256  }
 0x377   :  { %753 = vsyncadd [#allocation6], 4294967040 }
 0x378   :  { %491 = vsyncpa [#allocation5], 1 }
 0x379   :  { %492 = vsyncpa [#allocation8], 1 }
 0x37a   :  { %493 = vsyncpa [#allocation6], 1 }

// kernel: tpu_custom_call.1
= control target key start
LH: loop header
LB: loop body
LE: loop exit
PB: predicated region body
PF: predicated region fallthrough
CT: control target
= control target key end

     0   :  { %10 = vsyncpa [#allocation5], 0  ;;  %s839_s0 = inlined_call_operand.hbm [shape: f32[2,8,128], index: 0, kind: input, shape index: {}]   ;;  %s840_s1 = inlined_call_operand.hbm [shape: bf16[128,384], index: 1, kind: input, shape index: {}]   ;;  %s841_s2 = inlined_call_operand.hbm [shape: f32[1,384], index: 2, kind: input, shape index: {}]   ;;  %s842_s3 = inlined_call_operand.vmem [shape: f32[1,128], index: 3, kind: input, shape index: {}]   ;;  %s843_s4 = inlined_call_operand.vmem [shape: f32[1,128], index: 4, kind: input, shape index: {}]   ;;  %s844_s5 = inlined_call_operand.hbm [shape: f32[2,8,128], index: 5, kind: output, shape index: {}]  }
   0x1   :  { %11 = vsyncpa [#allocation8], 0  ;;  %s30_s20 = sshll.u32 %s840_s1, 4  ;;  %s31_s20 = int_to_ptr.hbm [resolvable:$true] %s30_s20 }
   0x2   :  { %12 = vsyncpa [#allocation6], 0  ;;  %s754_s21 = smov [#allocation7]   ;;  %s17_s25 = sshll.u32 %s839_s0, 4  ;;  %s18_s25 = int_to_ptr.hbm [resolvable:$true] %s17_s25 }
   0x3   :  { %s32_s22 = sshll.u32 %s754_s21, 4  ;;  %s755_s26 = smov 192   ;;  %s33_s22 = int_to_ptr.vmem [resolvable:$true] %s32_s22 }
   0x4   :  { %s756_s27 = smov 12   ;;  %s757_s28 = smov [#allocation4]  }
   0x5   :  { %38 = dma.hbm_to_vmem [thread:$0]  %s31_s20, 3072, %s33_s22, [#allocation8], %s755_s26, %s755_s26, %s756_s27  }
   0x6   :  { %s19_s29 = sshll.u32 %s757_s28, 4  ;;  %s758_s30 = smov 128   ;;  %s20_s29 = int_to_ptr.vmem [resolvable:$true] %s19_s29 }
   0x7   :  { %s759_s6 = smov 8   ;;  %s44_s8 = sshll.u32 %s841_s2, 4  ;;  %s45_s8 = int_to_ptr.hbm [resolvable:$true] %s44_s8 }
   0x8   :  { %25 = dma.hbm_to_vmem [thread:$0]  %s18_s25, 256, %s20_s29, [#allocation5], %s758_s30, %s758_s30, %s759_s6  }
   0x9   :  { %s760_s9 = smov [#allocation9]  }
   0xa   :  { %s46_s0 = sshll.u32 %s760_s9, 4  ;;  %s47_s0 = int_to_ptr.vmem [resolvable:$true] %s46_s0 }
   0xb   :  { %49 = dma.hbm_to_vmem [thread:$0]  %s45_s8, 48, %s47_s0, [#allocation8]  }
   0xc   :  { %748 = dma.done.wait [#allocation5], 256  }
   0xd   :  { %749 = vsyncadd [#allocation5], 4294967040 }
   0xe   :  { %750 = dma.done.wait [#allocation8], 3120  }
   0xf   :  { %751 = vsyncadd [#allocation8], 4294964176  ;;  %v613_v0 = vld [vmem:[#allocation7 + $0xac] sm:$0xf]  ;;  %v582_v1 = vld [vmem:[#allocation7 + $0xb4] sm:$0xf0] }
  0x10   :  { %v610_v2 = vld [vmem:[#allocation7 + $0x94] sm:$0xf]  ;;  %v585_v3 = vor.u32 %v613_v0, %v582_v1  ;;  %v570_v4 = vld [vmem:[#allocation7 + $0x9c] sm:$0xf0]  ;;  %v580_v5 = vld [vmem:[#allocation7 + $0xa8] sm:$0xf] }
  0x11   :  { %v573_v6 = vor.u32 %v610_v2, %v570_v4  ;;  %v607_v7 = vld [vmem:[#allocation7 + $0x7c] sm:$0xf]  ;;  %v614_v8 = vld [vmem:[#allocation7 + $0xb0] sm:$0xf0]  ;;  %v558_v9 = vld [vmem:[#allocation7 + $0x84] sm:$0xf0] }
  0x12   :  { %252 = vmatpush.bf16.msra.mxu1 %v585_v3  ;;  %v581_v10 = vor.u32 %v614_v8, %v580_v5  ;;  %v568_v11 = vld [vmem:[#allocation7 + $0x90] sm:$0xf]  ;;  %v611_v12 = vld [vmem:[#allocation7 + $0x98] sm:$0xf0]  ;;  %v561_v14 = vor.u32 %v607_v7, %v558_v9  ;;  %v556_v15 = vld [vmem:[#allocation7 + $0x78] sm:$0xf] }
  0x13   :  { %v569_v13 = vor.u32 %v611_v12, %v568_v11  ;;  %v608_v16 = vld [vmem:[#allocation7 + $0x80] sm:$0xf0]  ;;  %v546_v18 = vld [vmem:[#allocation7 + $0x6c] sm:$0xf0]  ;;  %v544_v21 = vld [vmem:[#allocation7 + $0x60] sm:$0xf] }
  0x14   :  { %238 = vmatpush.bf16.msra.mxu0 %v581_v10  ;;  %v604_v17 = vld [vmem:[#allocation7 + $0x64] sm:$0xf]  ;;  %v557_v19 = vor.u32 %v608_v16, %v556_v15  ;;  %v605_v22 = vld [vmem:[#allocation7 + $0x68] sm:$0xf0]  ;;  %v534_v24 = vld [vmem:[#allocation7 + $0x54] sm:$0xf0] }
  0x15   :  { %v549_v20 = vor.u32 %v604_v17, %v546_v18  ;;  %v601_v23 = vld [vmem:[#allocation7 + $0x4c] sm:$0xf]  ;;  %v545_v25 = vor.u32 %v605_v22, %v544_v21  ;;  %v532_v27 = vld [vmem:[#allocation7 + $0x48] sm:$0xf]  ;;  %v602_v28 = vld [vmem:[#allocation7 + $0x50] sm:$0xf0] }
  0x16   :  { %253 = vmatpush.bf16.msra.mxu1 %v573_v6  ;;  %v537_v26 = vor.u32 %v601_v23, %v534_v24  ;;  %v598_v29 = vld [vmem:[#allocation7 + $0x34] sm:$0xf]  ;;  %v522_v30 = vld [vmem:[#allocation7 + $0x3c] sm:$0xf0]  ;;  %v533_v31 = vor.u32 %v602_v28, %v532_v27  ;;  %v520_v33 = vld [vmem:[#allocation7 + $0x30] sm:$0xf]  ;;  %v290_v27 = vlaneseq }
  0x17   :  { %v525_v32 = vor.u32 %v598_v29, %v522_v30  ;;  %v599_v34 = vld [vmem:[#allocation7 + $0x38] sm:$0xf0]  ;;  %v510_v36 = vld [vmem:[#allocation7 + $0x24] sm:$0xf0]  ;;  %v508_v39 = vld [vmem:[#allocation7 + $0x18] sm:$0xf] }
  0x18   :  { %239 = vmatpush.bf16.msra.mxu0 %v569_v13  ;;  %v595_v35 = vld [vmem:[#allocation7 + $0x1c] sm:$0xf]  ;;  %v521_v37 = vor.u32 %v599_v34, %v520_v33  ;;  %v596_v40 = vld [vmem:[#allocation7 + $0x20] sm:$0xf0]  ;;  %v498_v42 = vld [vmem:[#allocation7 + $0xc] sm:$0xf0] }
  0x19   :  { %v513_v38 = vor.u32 %v595_v35, %v510_v36  ;;  %v592_v41 = vld [vmem:[#allocation7 + $0x4] sm:$0xf]  ;;  %v804_v43 = vld [vmem:[#allocation4] sm:$0xff]  ;;  %v509_v44 = vor.u32 %v596_v40, %v508_v39  ;;  %v806_v46 = vld [vmem:[#allocation4 + $0x8] sm:$0xff]  ;;  %v291_v28 = vshrl.u32 %v290_v27, 7  ;;  %v814_v29 = vand.u32 127, %v290_v27 }
  0x1a   :  { %254 = vmatpush.bf16.msra.mxu1 %v561_v14  ;;  %v501_v45 = vor.u32 %v592_v41, %v498_v42  ;;  %v496_v47 = vld [vmem:[#allocation7] sm:$0xf]  ;;  %v593_v48 = vld [vmem:[#allocation7 + $0x8] sm:$0xf0]  ;;  %v69_v49 = vpack.c.bf16 %v806_v46, %v804_v43  ;;  %v588_v58 = vld [vmem:[#allocation7 + $0xb0] sm:$0xf] }
  0x1b   :  { %v497_v50 = vor.u32 %v593_v48, %v496_v47  ;;  %v810_v52 = vld [vmem:[#allocation9] sm:$0x7]  ;;  %v615_v59 = vld [vmem:[#allocation7 + $0xb8] sm:$0xf0]  ;;  %v576_v60 = vld [vmem:[#allocation7 + $0x98] sm:$0xf]  ;;  %vm324_vm0 = vcmp.le.s32.totalorder %v814_v29, %v291_v28 }
  0x1c   :  { %240 = vmatpush.bf16.msra.mxu0 %v557_v19  ;;  %v105_v53 = vperm.slane %v810_v52, 1  ;;  %v589_v61 = vor.u32 %v615_v59, %v588_v58  ;;  %v612_v62 = vld [vmem:[#allocation7 + $0xa0] sm:$0xf0]  ;;  %v104_v0 = vperm.slane %v810_v52, 0  ;;  %v564_v1 = vld [vmem:[#allocation7 + $0x80] sm:$0xf] }
  0x1d   :  { %v577_v63 = vor.u32 %v612_v62, %v576_v60  ;;  %v609_v2 = vld [vmem:[#allocation7 + $0x88] sm:$0xf0]  ;;  %v552_v5 = vld [vmem:[#allocation7 + $0x68] sm:$0xf]  ;;  %v606_v9 = vld [vmem:[#allocation7 + $0x70] sm:$0xf0] }
  0x1e   :  { %255 = vmatpush.bf16.msra.mxu1 %v549_v20  ;;  %266 = vmatpush.bf16.msra.mxu2 %v589_v61  ;;  %v565_v4 = vor.u32 %v609_v2, %v564_v1  ;;  %v553_v10 = vor.u32 %v606_v9, %v552_v5  ;;  %v540_v12 = vld [vmem:[#allocation7 + $0x50] sm:$0xf]  ;;  %v603_v13 = vld [vmem:[#allocation7 + $0x58] sm:$0xf0]  ;;  %v528_v15 = vld [vmem:[#allocation7 + $0x38] sm:$0xf] }
  0x1f   :  { %v541_v14 = vor.u32 %v603_v13, %v540_v12  ;;  %v600_v16 = vld [vmem:[#allocation7 + $0x40] sm:$0xf0]  ;;  %v516_v18 = vld [vmem:[#allocation7 + $0x20] sm:$0xf]  ;;  %v597_v19 = vld [vmem:[#allocation7 + $0x28] sm:$0xf0] }
  0x20   :  { %241 = vmatpush.bf16.msra.mxu0 %v545_v25  ;;  %v529_v17 = vor.u32 %v600_v16, %v528_v15  ;;  %v517_v21 = vor.u32 %v597_v19, %v516_v18  ;;  %v504_v22 = vld [vmem:[#allocation7 + $0x8] sm:$0xf]  ;;  %v594_v23 = vld [vmem:[#allocation7 + $0x10] sm:$0xf0]  ;;  %vm329_vm1 = vcmask 64512   ;;  %vm361_vm2 = vcmask 1043456  }
  0x21   :  { %v505_v25 = vor.u32 %v594_v23, %v504_v22  ;;  %vm421_vm3 = vcmp.lt.s32.totalorder %v814_v29, 32  ;;  %s480_s16 = sshll.u32 %s844_s5, 4  ;;  %s481_s16 = int_to_ptr.hbm [resolvable:$true] %s480_s16 }
  0x22   :  { %256 = vmatpush.bf16.msra.mxu1 %v537_v26  ;;  %267 = vmatpush.bf16.msra.mxu2 %v577_v63 }
  0x24   :  { %242 = vmatpush.bf16.msra.mxu0 %v533_v31 }
  0x26   :  { %257 = vmatpush.bf16.msra.mxu1 %v525_v32  ;;  %268 = vmatpush.bf16.msra.mxu2 %v565_v4 }
  0x28   :  { %243 = vmatpush.bf16.msra.mxu0 %v521_v37 }
  0x2a   :  { %258 = vmatpush.bf16.msra.mxu1 %v513_v38  ;;  %269 = vmatpush.bf16.msra.mxu2 %v553_v10  ;;  %v106_v38 = vperm.slane %v810_v52, 2 }
  0x2c   :  { %244 = vmatpush.bf16.msra.mxu0 %v509_v44 }
  0x2e   :  { %259 = vmatpush.bf16.msra.mxu1 %v501_v45  ;;  %270 = vmatpush.bf16.msra.mxu2 %v541_v14 }
  0x30   :  { %245 = vmatpush.bf16.msra.mxu0 %v497_v50 }
  0x31   :  { %260 = vmatmul.bf16.vlgmr.msra.gmra.mxu1 %v69_v49 }
  0x32   :  { %271 = vmatpush.bf16.msra.mxu2 %v529_v17 }
  0x33   :  { %246 = vmatmul.bf16.vlgmr.msra.gmra.mxu0 %v69_v49 }
  0x36   :  { %272 = vmatpush.bf16.msra.mxu2 %v517_v21 }
  0x3a   :  { %273 = vmatpush.bf16.msra.mxu2 %v505_v25 }
  0x3d   :  { %274 = vmatmul.bf16.vlgmr.msra.gmra.mxu2 %v69_v49 }
  0xae   :  { %v261_v51 = vpop.f32.mrf.mxu1 }
  0xaf   :  { %v262_v55 = vadd.f32 %v261_v51, %v105_v53 }
  0xb0   :  { %v247_v3 = vpop.f32.mrf.mxu0 }
  0xb1   :  { %v248_v6 = vadd.f32 %v247_v3, %v104_v0 }
  0xb3   :  { %v280_v11 = vpack.c.bf16 %v248_v6, %v248_v6 }
  0xb6   :  { %v263_v54 = vpop.f32.mrf.mxu1 }
  0xb7   :  { %v264_v56 = vadd.f32 %v263_v54, %v105_v53 }
  0xb8   :  { %v249_v20 = vpop.f32.mrf.mxu0 }
  0xb9   :  { %v619_v57 = vpack.c.bf16 %v264_v56, %v262_v55  ;;  %v250_v24 = vadd.f32 %v249_v20, %v104_v0 }
  0xbb   :  { %620 = vst [vmem:[#allocation2] sm:$0xff] %v619_v57   ;;  %v281_v26 = vpack.c.bf16 %v250_v24, %v250_v24 }
  0xc0   :  { %v275_v37 = vpop.f32.mrf.mxu2 }
  0xc1   :  { %v276_v40 = vadd.f32 %v275_v37, %v106_v38 }
  0xc2   :  { %v294_v7 = vld [vmem:[#allocation2] sm:$0xf]  ;;  %v295_v8 = vld [vmem:[#allocation2 + $0x4] sm:$0xf] }
  0xc3   :  { %305 = vmatpush.bf16.xpose.msra.mxu3 %v294_v7 }
  0xc8   :  { %v277_v41 = vpop.f32.mrf.mxu2 }
  0xc9   :  { %v278_v42 = vadd.f32 %v277_v41, %v106_v38 }
  0xca   :  { %306 = vmatmul.bf16.vlgmr.msra.gmra.mxu3 %v280_v11 }
  0xcb   :  { %318 = vmatpush.bf16.xpose.msrb.mxu3 %v295_v8  ;;  %v624_v44 = vpack.c.bf16 %v278_v42, %v276_v40 }
  0xcd   :  { %625 = vst [vmem:[#allocation3] sm:$0xff] %v624_v44  }
  0xd4   :  { %v296_v45 = vld [vmem:[#allocation3] sm:$0xf]  ;;  %v297_v47 = vld [vmem:[#allocation3 + $0x4] sm:$0xf] }
  0xd5   :  { %v363_v48 = vsel %vm361_vm2, %v296_v45, 0  ;;  %v382_v49 = vsel %vm361_vm2, %v297_v47, 0 }
  0xd6   :  { %372 = vmatpush.bf16.msra.mxu3 %v363_v48  ;;  %391 = vmatpush.bf16.msrb.mxu0 %v382_v49 }
  0xda   :  { %319 = vmatmul.bf16.vlgmr.msrb.gmra.mxu3 %v281_v26 }
 0x14d   :  { %v307_v30 = vpop.f32.mrf.mxu3 }
 0x14e   :  { %v327_v31 = vsel %vm324_vm0, %v307_v30, -1e+30 }
 0x14f   :  { %v330_v32 = vsel %vm329_vm1, %v327_v31, -inf }
 0x150   :  { %331 = vmax.xlane.f32.xlu0 %v330_v32 }
 0x155   :  { %v309_v33 = vpop.f32.mrf.mxu3 }
 0x15d   :  { %v320_v34 = vpop.f32.mrf.mxu3 }
 0x15e   :  { %v328_v35 = vsel %vm324_vm0, %v320_v34, -1e+30 }
 0x15f   :  { %v333_v36 = vsel %vm329_vm1, %v328_v35, -inf }
 0x160   :  { %334 = vmax.xlane.f32.xlu0 %v333_v36 }
 0x165   :  { %v322_v39 = vpop.f32.mrf.mxu3 }
 0x1c3   :  { %v332_v50 = vpop.xlane.xlu0 %331 }
 0x1c4   :  { %v336_v51 = vmax.f32 %v332_v50, -1e+30 }
 0x1c6   :  { %v344_v53 = vsub.f32 %v327_v31, %v336_v51  ;;  %v338_v0 = vsub.f32 -1e+30, %v336_v51 }
 0x1c8   :  { %v346_v54 = vmul.f32 1.442695, %v344_v53  ;;  %v340_v1 = vmul.f32 1.442695, %v338_v0  ;;  %v634_v53 = vld [vmem:[%s842_s3] ss:$0 sm:$0xff] }
 0x1c9   :  { %s761_s3 = smov [#allocation10]  }
 0x1ca   :  { %636 = vpow2.f32 %v346_v54  ;;  %s478_s13 = sshll.u32 %s761_s3, 4  ;;  %s479_s13 = int_to_ptr.vmem [resolvable:$true] %s478_s13 }
 0x1d0   :  { %v637_v55 = vpop.eup %636 }
 0x1d1   :  { %v356_v52 = vpack.c.bf16 %v637_v55, %v637_v55  ;;  %v350_v56 = vsel %vm329_vm1, %v637_v55, 0.0 }
 0x1d2   :  { %351 = vadd.xlane.f32.xlu1 %v350_v56  ;;  %v635_v56 = vld [vmem:[%s843_s4] ss:$0 sm:$0xff] }
 0x1d3   :  { %v335_v57 = vpop.xlane.xlu0 %334  ;;  %590 = vmatmul.msk.bf16.vlgmr.msra.gmra.mxu3 %vm329_vm1, %v356_v52 }
 0x1d4   :  { %v337_v58 = vmax.f32 %v335_v57, -1e+30 }
 0x1d6   :  { %v345_v59 = vsub.f32 %v328_v35, %v337_v58  ;;  %v339_v3 = vsub.f32 -1e+30, %v337_v58 }
 0x1d8   :  { %v348_v60 = vmul.f32 1.442695, %v345_v59  ;;  %v342_v7 = vmul.f32 1.442695, %v339_v3 }
 0x1da   :  { %638 = vpow2.f32 %v348_v60 }
 0x1db   :  { %640 = vpow2.f32 %v340_v1 }
 0x1e0   :  { %v639_v61 = vpop.eup %638 }
 0x1e1   :  { %v353_v62 = vsel %vm329_vm1, %v639_v61, 0.0  ;;  %v357_v63 = vpack.c.bf16 %v639_v61, %v639_v61  ;;  %v641_v2 = vpop.eup %640 }
 0x1e2   :  { %354 = vadd.xlane.f32.xlu1 %v353_v62  ;;  %v397_v4 = vmul.f32 0.0, %v641_v2 }
 0x1e3   :  { %591 = vmatmul.msk.bf16.vlgmr.msrb.gmra.mxu0 %vm329_vm1, %v357_v63 }
 0x245   :  { %v352_v5 = vpop.xlane.xlu1 %351 }
 0x246   :  { %v399_v6 = vadd.f32 %v397_v4, %v352_v5 }
 0x248   :  { %642 = vrcp.f32 %v399_v6 }
 0x249   :  { %644 = vpow2.f32 %v342_v7 }
 0x24e   :  { %v643_v8 = vpop.eup %642 }
 0x24f   :  { %v405_v9 = vmul.f32 %v643_v8, %v399_v6  ;;  %v645_v10 = vpop.eup %644 }
 0x250   :  { %v398_v12 = vmul.f32 0.0, %v645_v10 }
 0x251   :  { %v407_v11 = vsub.f32 2.0, %v405_v9 }
 0x253   :  { %v409_v17 = vmul.f32 %v643_v8, %v407_v11 }
 0x255   :  { %v355_v13 = vpop.xlane.xlu1 %354 }
 0x256   :  { %v400_v14 = vadd.f32 %v398_v12, %v355_v13  ;;  %v374_v15 = vpop.f32.mrf.mxu3 }
 0x257   :  { %v401_v16 = vadd.f32 %v397_v4, %v374_v15 }
 0x258   :  { %646 = vrcp.f32 %v400_v14 }
 0x259   :  { %v411_v18 = vmul.f32 %v409_v17, %v401_v16 }
 0x25b   :  { %v413_v19 = vadd.f32 %v411_v18, %v804_v43 }
 0x25d   :  { %415 = vadd.xlane.f32.xlu2 %v413_v19 }
 0x25e   :  { %v647_v20 = vpop.eup %646  ;;  %v376_v21 = vpop.f32.mrf.mxu3 }
 0x25f   :  { %v406_v22 = vmul.f32 %v647_v20, %v400_v14 }
 0x260   :  { %v393_v23 = vpop.f32.mrf.mxu0 }
 0x261   :  { %v408_v24 = vsub.f32 2.0, %v406_v22  ;;  %v402_v25 = vadd.f32 %v398_v12, %v393_v23 }
 0x263   :  { %v410_v26 = vmul.f32 %v647_v20, %v408_v24 }
 0x265   :  { %v412_v27 = vmul.f32 %v410_v26, %v402_v25 }
 0x267   :  { %v414_v28 = vadd.f32 %v412_v27, %v806_v46 }
 0x268   :  { %v395_v30 = vpop.f32.mrf.mxu0 }
 0x269   :  { %417 = vadd.xlane.f32.xlu2 %v414_v28 }
 0x2d0   :  { %v416_v31 = vpop.xlane.xlu2 %415 }
 0x2d1   :  { %v419_v32 = vmul.f32 0.03125, %v416_v31 }
 0x2d3   :  { %v422_v33 = vsub.f32 %v413_v19, %v419_v32 }
 0x2d5   :  { %v426_v34 = vsel %vm421_vm3, %v422_v33, 0.0 }
 0x2d6   :  { %v428_v43 = vmul.f32 %v426_v34, %v426_v34 }
 0x2d8   :  { %430 = vadd.xlane.f32.xlu0 %v428_v43 }
 0x2dc   :  { %v418_v35 = vpop.xlane.xlu2 %417 }
 0x2dd   :  { %v420_v36 = vmul.f32 0.03125, %v418_v35 }
 0x2df   :  { %v423_v37 = vsub.f32 %v414_v28, %v420_v36 }
 0x2e1   :  { %v427_v38 = vsel %vm421_vm3, %v423_v37, 0.0 }
 0x2e2   :  { %v429_v39 = vmul.f32 %v427_v38, %v427_v38 }
 0x2e4   :  { %432 = vadd.xlane.f32.xlu1 %v429_v39 }
 0x34b   :  { %v431_v40 = vpop.xlane.xlu0 %430 }
 0x34c   :  { %v434_v41 = vmul.f32 0.03125, %v431_v40 }
 0x34e   :  { %v436_v42 = vadd.f32 1e-05, %v434_v41 }
 0x350   :  { %648 = vrsqrt.f32 %v436_v42  ;;  %vm444_vm5 = vweird.f32 %v436_v42 }
 0x356   :  { %v649_v46 = vpop.eup %648 }
 0x357   :  { %v439_v44 = vmul.f32 %v649_v46, %v436_v42  ;;  %v433_v45 = vpop.xlane.xlu1 %432  ;;  %vm445_vm4 = vweird.f32 %v649_v46 }
 0x358   :  { %v435_v47 = vmul.f32 0.03125, %v433_v45  ;;  %vm446_vm6 = vmor %vm444_vm5, %vm445_vm4 }
 0x359   :  { %v440_v48 = vmul.f32 %v649_v46, %v439_v44 }
 0x35a   :  { %v437_v29 = vadd.f32 1e-05, %v435_v47 }
 0x35b   :  { %v441_v49 = vmul.f32 0.5, %v440_v48 }
 0x35c   :  { %650 = vrsqrt.f32 %v437_v29  ;;  %vm454_vm8 = vweird.f32 %v437_v29 }
 0x35d   :  { %v442_v50 = vsub.f32 1.5, %v441_v49 }
 0x35f   :  { %v443_v51 = vmul.f32 %v649_v46, %v442_v50 }
 0x361   :  { %v447_v54 = vsel %vm446_vm6, %v649_v46, %v443_v51 }
 0x362   :  { %v651_v55 = vpop.eup %650  ;;  %v458_v52 = vmul.f32 %v447_v54, %v426_v34 }
 0x363   :  { %v449_v57 = vmul.f32 %v651_v55, %v437_v29  ;;  %vm455_vm7 = vweird.f32 %v651_v55 }
 0x364   :  { %v464_v58 = vmul.f32 %v634_v53, %v458_v52  ;;  %vm456_vm9 = vmor %vm454_vm8, %vm455_vm7 }
 0x365   :  { %v450_v59 = vmul.f32 %v651_v55, %v449_v57 }
 0x366   :  { %v470_v60 = vadd.f32 %v635_v56, %v464_v58 }
 0x367   :  { %v451_v61 = vmul.f32 0.5, %v450_v59 }
 0x368   :  { %472 = vst [vmem:[#allocation10] sm:$0xff] %v470_v60 }
 0x369   :  { %v452_v62 = vsub.f32 1.5, %v451_v61 }
 0x36b   :  { %v453_v63 = vmul.f32 %v651_v55, %v452_v62 }
 0x36d   :  { %v457_v0 = vsel %vm456_vm9, %v651_v55, %v453_v63 }
 0x36e   :  { %v459_v1 = vmul.f32 %v457_v0, %v427_v38 }
 0x370   :  { %v465_v2 = vmul.f32 %v634_v53, %v459_v1 }
 0x372   :  { %v471_v3 = vadd.f32 %v635_v56, %v465_v2 }
 0x374   :  { %473 = vst [vmem:[#allocation10 + $0x8] sm:$0xff] %v471_v3 }
 0x375   :  { %486 = dma.vmem_to_hbm [thread:$0]  %s479_s13, 256, %s481_s16, [#allocation6], %s758_s30, %s758_s30, %s759_s6  }
 0x376   :  { %752 = dma.done.wait [#allocation6], 256  }
 0x377   :  { %753 = vsyncadd [#allocation6], 4294967040 }
 0x378   :  { %491 = vsyncpa [#allocation5], 1 }
 0x379   :  { %492 = vsyncpa [#allocation8], 1 }
 0x37a   :  { %493 = vsyncpa [#allocation6], 1 }

</bundles_post_ra>
